<compile_context>
chip_gen: v7x
topology: tpu7x:2x2x1
jax: 0.10.0
libtpu: 0.0.40
codegen_flags: <defaults>
</compile_context>

<pallas_src>
import math
from functools import partial

import numpy as np
import jax
import jax.numpy as jnp
from jax import lax
from jax.experimental import pallas as pl
from jax.experimental.pallas import tpu as pltpu


_LANE = 128
_SUBLANE = 8
_VMEM_BUDGET = 20 * 1024 * 1024      # double-buffered block budget per grid step
_TT_CAP = 512                        # max output-time rows per grid step


def _round_up(x, m):
    return ((x + m - 1) // m) * m


# ----------------------------------------------------------------------------
# Pallas conv1d kernel (one (group, cout-tile, time-tile) step)
# ----------------------------------------------------------------------------
def _conv_kernel(x_ref, w_ref, b_ref, o_ref, *, Kq, B, Tt, apply_relu, alpha):
    # x_ref: (1, B, 1, Tt + Kq - 1, Ceff)   polyphase / im2col rows
    # w_ref: (1, Kq, Ceff, Ct)
    # b_ref: (1, 1, Ct)
    # o_ref: (1, B, 1, Tt, Ct)
    Ceff = x_ref.shape[-1]
    Ct = o_ref.shape[-1]
    acc = jnp.zeros((B * Tt, Ct), jnp.float32)
    for q in range(Kq):                                   # unrolled, Kq <= 14
        xq = x_ref[0, :, 0, q:q + Tt, :].reshape(B * Tt, Ceff)
        acc = acc + jnp.dot(xq, w_ref[0, q, :, :],
                            preferred_element_type=jnp.float32)
    acc = acc + b_ref[0, :, :]                            # (1, Ct) broadcast
    if apply_relu:
        acc = jnp.where(acc >= 0, acc, alpha * acc)
    o_ref[0, :, 0, :, :] = acc.reshape(B, Tt, Ct).astype(o_ref.dtype)


def _choose_tiles(Bsz, T_out, Kq_eff, Ceff, C_out_gp, itemsize=4):
    """Pick (Ct, Tt) so double-buffered blocks fit the VMEM budget."""
    Ct = 256 if (C_out_gp % 256 == 0) else 128
    if Ct > 128 and 2 * Kq_eff * Ceff * Ct * itemsize > _VMEM_BUDGET // 2:
        Ct = 128
    w_bytes = 2 * Kq_eff * Ceff * Ct * itemsize
    per_row = 2 * Bsz * (Ceff + Ct) * itemsize
    tt_budget = max(_SUBLANE, (_VMEM_BUDGET - w_bytes) // max(per_row, 1))
    T_out_8 = _round_up(max(T_out, 1), _SUBLANE)
    Tt = max(_SUBLANE,
             min(_TT_CAP, (tt_budget // _SUBLANE) * _SUBLANE, T_out_8))
    return Ct, Tt


def pallas_conv1d(x, w, b, *, stride=1, groups=1, pad_left=0, pad_right=0,
                  pad_mode="constant", apply_relu=False, alpha=0.2,
                  tile_t=None, tile_c=None):
    """Grouped 1-D conv (PyTorch Conv1d semantics) + optional LeakyReLU.

    x : (B, T, C_in)  channel-last
    w : (C_out, C_in_g, K)  PyTorch weight layout
    b : (C_out,)
    returns (B, T_out, C_out)  channel-last, float32
    """
    Bsz, _, C_in = x.shape
    C_out, C_in_g, K = w.shape
    G = groups
    assert C_in == C_in_g * G and C_out % G == 0
    C_out_g = C_out // G
    s = stride

    if pad_left or pad_right:
        x = jnp.pad(x, ((0, 0), (pad_left, pad_right), (0, 0)), mode=pad_mode)
    T_cpad = x.shape[1]
    T_out = (T_cpad - K) // s + 1
    assert T_out >= 1

    Kq = -(-K // s)                          # ceil(K / stride)
    sC = s * C_in_g                          # contraction per tap (phase folded)
    use_im2col = (sC < _LANE) and (Kq * sC <= 2048)
    Kq_eff = 1 if use_im2col else Kq
    Ceff = Kq * sC if use_im2col else sC
    C_out_gp = _round_up(C_out_g, _LANE)     # lane-dense output channels

    Ct, Tt = _choose_tiles(Bsz, T_out, Kq_eff, Ceff, C_out_gp)
    if tile_c is not None:
        Ct = int(tile_c)
    if tile_t is not None:
        Tt = int(tile_t)
    T_out_8 = _round_up(T_out, _SUBLANE)
    Tt = min(Tt, T_out_8)
    assert Ct % _LANE == 0 and C_out_gp % Ct == 0 and Tt % _SUBLANE == 0
    n_co = C_out_gp // Ct
    n_t = -(-T_out_8 // Tt)
    T_out_pad = n_t * Tt

    # ---- glue: pad/slice time, polyphase + group re-layout ------------------
    R = T_out_pad + Kq - 1                   # phase-domain rows needed
    T_need = R * s
    if T_need > T_cpad:
        x = jnp.pad(x, ((0, 0), (0, T_need - T_cpad), (0, 0)))
    elif T_need < T_cpad:
        x = x[:, :T_need, :]
    xg = x.reshape(Bsz, R, s, G, C_in_g).transpose(3, 0, 1, 2, 4)
    xg = xg.reshape(G, Bsz, R, sC)           # (G, B, R, s*C_in_g)

    wp = jnp.pad(w, ((0, 0), (0, 0), (0, Kq * s - K)))
    wg = wp.reshape(G, C_out_g, C_in_g, Kq, s).transpose(0, 3, 4, 2, 1)
    wg = wg.reshape(G, Kq, sC, C_out_g)
    if C_out_gp != C_out_g:
        wg = jnp.pad(wg, ((0, 0), (0, 0), (0, 0), (0, C_out_gp - C_out_g)))
    bg = b.reshape(G, C_out_g)
    if C_out_gp != C_out_g:
        bg = jnp.pad(bg, ((0, 0), (0, C_out_gp - C_out_g)))
    bg = bg.reshape(G, 1, C_out_gp)

    if use_im2col:
        # fold the tap axis into the contraction: (G, B, T_out_pad, Kq*sC)
        xsrc = jnp.concatenate(
            [xg[:, :, q:q + T_out_pad, :] for q in range(Kq)], axis=-1)
        wsrc = wg.reshape(G, 1, Kq * sC, C_out_gp)
    else:
        xsrc = xg                            # (G, B, R, sC)
        wsrc = wg                            # (G, Kq, sC, C_out_gp)

    # ---- time blocks (halo of Kq_eff-1 rows duplicated when tiled) ----------
    Thalo = Tt + Kq_eff - 1
    if n_t == 1:
        xblk = xsrc[:, :, None, :, :]
    elif Kq_eff == 1:
        xblk = xsrc.reshape(G, Bsz, n_t, Tt, Ceff)
    else:
        xblk = jnp.stack(
            [lax.slice_in_dim(xsrc, j * Tt, j * Tt + Thalo, axis=2)
             for j in range(n_t)], axis=2)
    # xblk: (G, B, n_t, Thalo, Ceff)

    kernel = partial(_conv_kernel, Kq=Kq_eff, B=Bsz, Tt=Tt,
                     apply_relu=apply_relu, alpha=float(alpha))

    flops = 2 * G * Bsz * T_out_pad * Kq_eff * Ceff * C_out_gp
    bytes_acc = 4 * (xblk.size + wsrc.size + bg.size
                     + G * Bsz * T_out_pad * C_out_gp)

    out = pl.pallas_call(
        kernel,
        out_shape=jax.ShapeDtypeStruct((G, Bsz, n_t, Tt, C_out_gp), jnp.float32),
        grid=(G, n_co, n_t),
        in_specs=[
            pl.BlockSpec((1, Bsz, 1, Thalo, Ceff),
                         lambda g, jc, jt: (g, 0, jt, 0, 0)),
            pl.BlockSpec((1, Kq_eff, Ceff, Ct),
                         lambda g, jc, jt: (g, 0, 0, jc)),
            pl.BlockSpec((1, 1, Ct),
                         lambda g, jc, jt: (g, 0, jc)),
        ],
        out_specs=pl.BlockSpec((1, Bsz, 1, Tt, Ct),
                               lambda g, jc, jt: (g, 0, jt, 0, jc)),
        compiler_params=pltpu.CompilerParams(
            dimension_semantics=("parallel", "parallel", "parallel"),
            vmem_limit_bytes=40 * 1024 * 1024),
        cost_estimate=pl.CostEstimate(flops=int(flops), transcendentals=0,
                                      bytes_accessed=int(bytes_acc)),
    )(xblk, wsrc, bg)

    # (G, B, n_t, Tt, C_out_gp) -> (B, T_out, C_out)  channel-last
    out = out.transpose(1, 2, 3, 0, 4).reshape(Bsz, T_out_pad, G, C_out_gp)
    out = out[:, :T_out, :, :C_out_g].reshape(Bsz, T_out, C_out)
    return out


# ----------------------------------------------------------------------------
# MelGAN discriminator (single scale)
# ----------------------------------------------------------------------------
_MELGAN_CFG = [
    # (C_in, C_out,  K, stride, groups, pad, pad_mode,   leaky_relu)
    (1,     16,     15, 1,      1,      7,   "reflect",  True),
    (16,    64,     41, 4,      4,      20,  "constant", True),
    (64,    256,    41, 4,      4,      20,  "constant", True),
    (256,   1024,   41, 4,      4,      20,  "constant", True),
    (1024,  1024,   41, 4,      4,      20,  "constant", True),
    (1024,  1024,   5,  1,      1,      2,   "constant", True),
    (1024,  1,      3,  1,      1,      1,   "constant", False),
]


def init_discriminator_params(key):
    """Deterministic synthetic params. weight_norm (g * v/||v||) folded at init."""
    params = []
    for (cin, cout, k, _, g, _, _, _) in _MELGAN_CFG:
        key, kv, kg, kb = jax.random.split(key, 4)
        v = jax.random.normal(kv, (cout, cin // g, k), jnp.float32)
        gain = 1.0 + 0.1 * jax.random.normal(kg, (cout,), jnp.float32)
        norm = jnp.sqrt(jnp.sum(v * v, axis=(1, 2), keepdims=True)) + 1e-12
        w = gain[:, None, None] * v / norm
        b = 0.01 * jax.random.normal(kb, (cout,), jnp.float32)
        params.append((w, b))
    return params


def discriminator_melgan_forward(audio, params, alpha):
    """audio: (B, 1, T) channel-first.  Returns list of (B, C, T) embeddings."""
    embeddings = [audio]
    x = audio.transpose(0, 2, 1)                       # channel-last chain
    for cfg, (w, b) in zip(_MELGAN_CFG, params):
        _, _, _, st, g, pad, mode, relu = cfg
        x = pallas_conv1d(x, w, b, stride=st, groups=g, pad_left=pad,
                          pad_right=pad, pad_mode=mode,
                          apply_relu=relu, alpha=alpha)
        embeddings.append(x.transpose(0, 2, 1))        # (B, C, T) for the list
    return embeddings


# ----------------------------------------------------------------------------
# torchaudio-style sinc_interp_kaiser resampling (filter design in glue,
# resampling convolution through the same Pallas conv kernel)
# ----------------------------------------------------------------------------
def _kaiser_sinc_kernel(orig, new, lowpass_filter_width=6, rolloff=0.99,
                        beta=14.769656459379492):
    base_freq = min(orig, new) * rolloff
    width = math.ceil(lowpass_filter_width * orig / base_freq)
    idx = jnp.arange(-width, width + orig, dtype=jnp.float32) / orig        # (kw,)
    t = (-jnp.arange(new, dtype=jnp.float32) / new)[:, None] + idx[None, :]  # (new, kw)
    t = t * base_freq
    t = jnp.clip(t, -lowpass_filter_width, lowpass_filter_width)
    window = jnp.i0(beta * jnp.sqrt(jnp.maximum(
        0.0, 1.0 - (t / lowpass_filter_width) ** 2))) / jnp.i0(
            jnp.asarray(beta, jnp.float32))
    t = t * jnp.pi
    scale = base_freq / orig
    kern = jnp.where(t == 0.0, jnp.float32(1.0), jnp.sin(t) / t)
    kern = (kern * window * scale).astype(jnp.float32)
    return kern[:, None, :], width                                           # (new, 1, kw)


def kaiser_resample(x, orig_freq, new_freq):
    if orig_freq == new_freq:
        return x
    g = math.gcd(orig_freq, new_freq)
    o, n = orig_freq // g, new_freq // g
    B, C, L = x.shape
    kern, width = _kaiser_sinc_kernel(o, n)            # (n, 1, kw)
    xcl = x.reshape(B * C, L, 1)                       # channel-last, C_in = 1
    y = pallas_conv1d(xcl, kern, jnp.zeros((n,), jnp.float32), stride=o,
                      groups=1, pad_left=width, pad_right=width + o,
                      pad_mode="constant", apply_relu=False)
    y = y.reshape(B * C, -1)                           # interleave phases
    target = int(math.ceil(n * L / o))
    return y[:, :target].reshape(B, C, target)


def melgan_multi_scales_forward(audio, scale_params, sample_rate, alpha=0.2):
    downsampled = [kaiser_resample(audio, sample_rate, sample_rate // (2 ** s))
                   for s in range(len(scale_params))]
    return [discriminator_melgan_forward(sig, scale_params[s], alpha)
            for s, sig in enumerate(downsampled)]


# ----------------------------------------------------------------------------
# Pure-JAX reference (lax.conv) for correctness check
# ----------------------------------------------------------------------------
def _ref_conv1d(x, w, b, stride, groups, pad_l, pad_r, mode, relu, alpha):
    xp = jnp.pad(x, ((0, 0), (0, 0), (pad_l, pad_r)), mode=mode)
    y = lax.conv_general_dilated(xp, w, (stride,), "VALID",
                                 dimension_numbers=("NCH", "OIH", "NCH"),
                                 feature_group_count=groups)
    y = y + b[None, :, None]
    if relu:
        y = jnp.where(y >= 0, y, alpha * y)
    return y


def _ref_resample(x, orig_freq, new_freq):
    if orig_freq == new_freq:
        return x
    g = math.gcd(orig_freq, new_freq)
    o, n = orig_freq // g, new_freq // g
    B, C, L = x.shape
    kern, width = _kaiser_sinc_kernel(o, n)
    xp = jnp.pad(x.reshape(B * C, 1, L), ((0, 0), (0, 0), (width, width + o)))
    y = lax.conv_general_dilated(xp, kern, (o,), "VALID",
                                 dimension_numbers=("NCH", "OIH", "NCH"))
    y = y.transpose(0, 2, 1).reshape(B * C, -1)
    target = int(math.ceil(n * L / o))
    return y[:, :target].reshape(B, C, target)


def _ref_multi_scales(audio, scale_params, sample_rate, alpha):
    outs = []
    for s in range(len(scale_params)):
        x = _ref_resample(audio, sample_rate, sample_rate // (2 ** s))
        embeddings = [x]
        for cfg, (w, b) in zip(_MELGAN_CFG, scale_params[s]):
            _, _, _, st, g, pad, mode, relu = cfg
            x = _ref_conv1d(x, w, b, st, g, pad, pad, mode, relu, alpha)
            embeddings.append(x)
        outs.append(embeddings)
    return outs


# ----------------------------------------------------------------------------
if __name__ == "__main__":
    key = jax.random.PRNGKey(0)

    # --- small standalone conv tests exercising the tiled grid paths --------
    key, k1, k2, k3, k4, k5, k6 = jax.random.split(key, 7)
    # (a) im2col path (small s*C_in_g), multiple C_out and time tiles
    xa = jax.random.normal(k1, (2, 512, 16), jnp.float32)
    wa = 0.1 * jax.random.normal(k2, (256, 16, 41), jnp.float32)
    ba = 0.01 * jax.random.normal(k3, (256,), jnp.float32)
    ya = pallas_conv1d(xa, wa, ba, stride=4, groups=1, pad_left=20,
                       pad_right=20, apply_relu=True, alpha=0.2,
                       tile_t=64, tile_c=128)
    ya = jax.block_until_ready(ya)
    ya_ref = _ref_conv1d(xa.transpose(0, 2, 1), wa, ba, 4, 1, 20, 20,
                         "constant", True, 0.2).transpose(0, 2, 1)
    np.testing.assert_allclose(np.asarray(ya), np.asarray(ya_ref),
                               rtol=2e-3, atol=2e-3)

    # (b) per-tap path (grouped, deep contraction), multiple tiles
    xb = jax.random.normal(k4, (2, 512, 256), jnp.float32)
    wb = 0.05 * jax.random.normal(k5, (1024, 64, 41), jnp.float32)
    bb = 0.01 * jax.random.normal(k6, (1024,), jnp.float32)
    yb = pallas_conv1d(xb, wb, bb, stride=4, groups=4, pad_left=20,
                       pad_right=20, apply_relu=True, alpha=0.2,
                       tile_t=64, tile_c=128)
    yb = jax.block_until_ready(yb)
    yb_ref = _ref_conv1d(xb.transpose(0, 2, 1), wb, bb, 4, 4, 20, 20,
                         "constant", True, 0.2).transpose(0, 2, 1)
    np.testing.assert_allclose(np.asarray(yb), np.asarray(yb_ref),
                               rtol=2e-3, atol=2e-3)

    # --- full MelganMultiScalesDiscriminator forward -------------------------
    B, samples, sample_rate, scales, alpha = 2, 256, 16000, 3, 0.2
    key, ka = jax.random.split(key)
    audio = jax.random.normal(ka, (B, 1, samples), jnp.float32)

    scale_params = []
    for _ in range(scales):
        key, kp = jax.random.split(key)
        scale_params.append(init_discriminator_params(kp))

    out = melgan_multi_scales_forward(audio, scale_params, sample_rate, alpha)
    out = jax.block_until_ready(out)

    ref = _ref_multi_scales(audio, scale_params, sample_rate, alpha)
    ref = jax.block_until_ready(ref)
    assert len(out) == scales
    for emb_p, emb_r in zip(out, ref):
        assert len(emb_p) == len(_MELGAN_CFG) + 1
        for e_p, e_r in zip(emb_p, emb_r):
            assert e_p.shape == e_r.shape and e_p.dtype == e_r.dtype
            np.testing.assert_allclose(np.asarray(e_p), np.asarray(e_r),
                                       rtol=2e-3, atol=2e-3)

    print("KERNEL_OK")
</pallas_src>

<mosaic_0001>
module attributes {stable_mosaic.version = 11 : i64} {
  func.func @_conv_kernel(%arg0: i32, %arg1: i32, %arg2: i32, %arg3: memref<1x2x1x64x704xf32, #tpu.memory_space<vmem>>, %arg4: memref<1x1x704x128xf32, #tpu.memory_space<vmem>>, %arg5: memref<1x1x128xf32, #tpu.memory_space<vmem>>, %arg6: memref<1x2x1x64x128xf32, #tpu.memory_space<vmem>>) attributes {dimension_semantics = [#tpu.dimension_semantics<parallel>, #tpu.dimension_semantics<parallel>, #tpu.dimension_semantics<parallel>], iteration_bounds = array<i64: 1, 2, 2>, scalar_prefetch = 0 : i64, scratch_operands = 0 : i64, tpu.core_type = #tpu.core_type<tc>, window_params = [{transform_indices = @transform_0, window_bounds = array<i64: 1, 2, 1, 64, 704>}, {transform_indices = @transform_1, window_bounds = array<i64: 1, 1, 704, 128>}, {transform_indices = @transform_2, window_bounds = array<i64: 1, 1, 128>}, {transform_indices = @transform_3, window_bounds = array<i64: 1, 2, 1, 64, 128>}]} {
    %cst = arith.constant 0.000000e+00 : f32
    %0 = vector.broadcast %cst : f32 to vector<128x128xf32>
    %c0 = arith.constant 0 : index
    %c0_0 = arith.constant 0 : index
    %c0_1 = arith.constant 0 : index
    %c0_2 = arith.constant 0 : index
    %c0_3 = arith.constant 0 : index
    %1 = vector.load %arg3[%c0, %c0_0, %c0_1, %c0_2, %c0_3] : memref<1x2x1x64x704xf32, #tpu.memory_space<vmem>>, vector<1x2x1x64x704xf32>
    %2 = vector.shape_cast %1 : vector<1x2x1x64x704xf32> to vector<2x64x704xf32>
    %3 = vector.shape_cast %2 : vector<2x64x704xf32> to vector<128x704xf32>
    %c0_4 = arith.constant 0 : index
    %c0_5 = arith.constant 0 : index
    %c0_6 = arith.constant 0 : index
    %c0_7 = arith.constant 0 : index
    %4 = vector.load %arg4[%c0_4, %c0_5, %c0_6, %c0_7] : memref<1x1x704x128xf32, #tpu.memory_space<vmem>>, vector<1x1x704x128xf32>
    %5 = vector.shape_cast %4 : vector<1x1x704x128xf32> to vector<704x128xf32>
    %cst_8 = arith.constant dense<0.000000e+00> : vector<128x128xf32>
    %6 = tpu.matmul %3, %5, %cst_8 {dimension_numbers = #tpu.dot_dimension_numbers<[1], [0], [0], [1], [0, 0, 1, 1], [], []>} : vector<128x704xf32>, vector<704x128xf32>, vector<128x128xf32> -> vector<128x128xf32>
    %7 = arith.addf %0, %6 : vector<128x128xf32>
    %c0_9 = arith.constant 0 : index
    %c0_10 = arith.constant 0 : index
    %c0_11 = arith.constant 0 : index
    %8 = vector.load %arg5[%c0_9, %c0_10, %c0_11] : memref<1x1x128xf32, #tpu.memory_space<vmem>>, vector<1x1x128xf32>
    %9 = vector.shape_cast %8 : vector<1x1x128xf32> to vector<1x128xf32>
    %10 = vector.broadcast %9 : vector<1x128xf32> to vector<128x128xf32>
    %11 = arith.addf %7, %10 : vector<128x128xf32>
    %cst_12 = arith.constant 0.000000e+00 : f32
    %12 = vector.broadcast %cst_12 : f32 to vector<128x128xf32>
    %13 = arith.cmpf oge, %11, %12 : vector<128x128xf32>
    %cst_13 = arith.constant 2.000000e-01 : f32
    %14 = vector.broadcast %cst_13 : f32 to vector<128x128xf32>
    %15 = arith.mulf %14, %11 : vector<128x128xf32>
    %16 = arith.select %13, %11, %15 : vector<128x128xi1>, vector<128x128xf32>
    %17 = vector.shape_cast %16 : vector<128x128xf32> to vector<2x64x128xf32>
    %c0_14 = arith.constant 0 : index
    %c0_15 = arith.constant 0 : index
    %c0_16 = arith.constant 0 : index
    %c0_17 = arith.constant 0 : index
    %c0_18 = arith.constant 0 : index
    %18 = vector.load %arg6[%c0_14, %c0_15, %c0_16, %c0_17, %c0_18] : memref<1x2x1x64x128xf32, #tpu.memory_space<vmem>>, vector<1x2x1x64x128xf32>
    %19 = vector.shape_cast %18 : vector<1x2x1x64x128xf32> to vector<2x64x128xf32>
    %20 = vector.shape_cast %17 : vector<2x64x128xf32> to vector<1x2x1x64x128xf32>
    tpu.vector_store %arg6[%c0_14, %c0_15, %c0_16, %c0_17, %c0_18], %20 {strides = array<i32>} : memref<1x2x1x64x128xf32, #tpu.memory_space<vmem>>, vector<1x2x1x64x128xf32>,
    return
  }
  func.func @transform_0(%arg0: i32, %arg1: i32, %arg2: i32) -> (i32, i32, i32, i32, i32) {
    %c0_i32 = arith.constant 0 : i32
    %c0_i32_0 = arith.constant 0 : i32
    %c0_i32_1 = arith.constant 0 : i32
    %c0_i32_2 = arith.constant 0 : i32
    return %arg0, %c0_i32, %arg2, %c0_i32_0, %c0_i32_1 : i32, i32, i32, i32, i32
  }
  func.func @transform_1(%arg0: i32, %arg1: i32, %arg2: i32) -> (i32, i32, i32, i32) {
    %c0_i32 = arith.constant 0 : i32
    %c0_i32_0 = arith.constant 0 : i32
    %c0_i32_1 = arith.constant 0 : i32
    return %arg0, %c0_i32, %c0_i32_0, %arg1 : i32, i32, i32, i32
  }
  func.func @transform_2(%arg0: i32, %arg1: i32, %arg2: i32) -> (i32, i32, i32) {
    %c0_i32 = arith.constant 0 : i32
    %c0_i32_0 = arith.constant 0 : i32
    return %arg0, %c0_i32, %arg1 : i32, i32, i32
  }
  func.func @transform_3(%arg0: i32, %arg1: i32, %arg2: i32) -> (i32, i32, i32, i32, i32) {
    %c0_i32 = arith.constant 0 : i32
    %c0_i32_0 = arith.constant 0 : i32
    %c0_i32_1 = arith.constant 0 : i32
    return %arg0, %c0_i32, %arg2, %c0_i32_0, %arg1 : i32, i32, i32, i32, i32
  }
}

</mosaic_0001>

<bundles_post_ra>
// kernel: tpu_custom_call.1
= control target key start
LH: loop header
LB: loop body
LE: loop exit
PB: predicated region body
PF: predicated region fallthrough
CT: control target
= control target key end

     0   :  { %s2492_s0 = inlined_call_operand.hbm [shape: f32[1,2,2,64,704], index: 0, kind: input, shape index: {}]   ;;  %s2493_s1 = inlined_call_operand.hbm [shape: f32[1,1,704,256], index: 1, kind: input, shape index: {}]   ;;  %s2494_s2 = inlined_call_operand.vmem [shape: f32[1,1,256], index: 2, kind: input, shape index: {}]   ;;  %s2495_s3 = inlined_call_operand.hbm [shape: f32[1,2,2,64,256], index: 3, kind: output, shape index: {}]  }
   0x1   :  { %2505 = sst [smem:[#allocation26_spill]] %s2492_s0 }
   0x2   :  { %2506 = sst [smem:[#allocation27_spill]] %s2495_s3 }
   0x3   :  { %8 = vsyncpa [#allocation3], 0 }
   0x4   :  { %10 = vsyncpa [#allocation3 + $0x1], 0 }
   0x5   :  { %11 = vsyncpa [#allocation6], 0 }
   0x6   :  { %13 = vsyncpa [#allocation6 + $0x1], 0 }
   0x7   :  { %14 = vsyncpa [#allocation4], 0 }
   0x8   :  { %16 = vsyncpa [#allocation4 + $0x1], 0  ;;  %s1895_s12 = smov 0   ;;  %s1897_s13 = smov 0  }
   0x9   :  { %s1899_s14 = smov 0   ;;  %s1901_s15 = smov 0  }
   0xa   :  { %s1903_s16 = smov 0   ;;  %s1905_s17 = smov 0  }
   0xb   :  { %s1907_s18 = smov 0   ;;  %s1909_s19 = smov 0  }
   0xc   :  { %s1911_s20 = smov 0   ;;  %s1913_s21 = smov 0  }
   0xd   :  { %s1915_s22 = smov 0   ;;  %s1917_s23 = smov 0  }
   0xe   :  { %s1919_s24 = smov 0   ;;  %s1921_s25 = smov 0  }
   0xf LB: > { %2507 = sst [smem:[#allocation16_spill]] %s1803_s12  ;;  %s1231_s26 = sadd.s32 4294967295, %s1855_s25   ;;  %s1855_s25 = sphi %s1921_s25, %s22_s25   ;;  %s1851_s24 = sphi %s1919_s24, %s2548_s24   ;;  %s1847_s23 = sphi %s1917_s23, %s2538_s23   ;;  %s1843_s22 = sphi %s1915_s22, %s2547_s22   ;;  %s1839_s21 = sphi %s1913_s21, %s2537_s21   ;;  %s1835_s20 = sphi %s1911_s20, %s2536_s20   ;;  %s1831_s19 = sphi %s1909_s19, %s2546_s19   ;;  %s1827_s18 = sphi %s1907_s18, %s2545_s18   ;;  %s1823_s17 = sphi %s1905_s17, %s2544_s17   ;;  %s1819_s16 = sphi %s1903_s16, %s2543_s16   ;;  %s1815_s15 = sphi %s1901_s15, %s2542_s15   ;;  %s1811_s14 = sphi %s1899_s14, %s2533_s14   ;;  %s1807_s13 = sphi %s1897_s13, %s2541_s13   ;;  %s1803_s12 = sphi %s1895_s12, %s2540_s12  }
  0x10   : > { %2508 = sst [smem:[#allocation17_spill]] %s1811_s14  ;;  %s34_s28 = sadd.s32 1, %s1847_s23 }
  0x11   : > { %2509 = sst [smem:[#allocation18_spill]] %s1835_s20  ;;  %s37_s29 = sadd.s32 1, %s1851_s24 }
  0x12   : > { %2510 = sst [smem:[#allocation19_spill]] %s1847_s23  ;;  %p35_p0 = scmp.ge.s32.totalorder %s34_s28, 2 }
  0x13   : > { %s50_s30 = sadd.s32 1, %s1835_s20  ;;  %p57_p1 = scmp.ne.s32.totalorder %s1835_s20, %s1831_s19 }
  0x14   : > { %p58_p2 = scmp.eq.s32.totalorder %s1855_s25, 0  ;;  %s2550_s28 = smov (%p35_p0, %s34_s28), 0 }
  0x15   : > { %2511 = sst [smem:[#allocation20_spill]] %s2550_s28  ;;  %s2552_s29 = smov (!%p35_p0, %s37_s29), %s1851_s24 }
  0x16   : > { %s46_s4 = ssub.s32 %s1847_s23, %s2550_s28  ;;  %p1978_p3 = por %p58_p2, %p57_p1 }
  0x17   : > { %p39_p4 = scmp.ge.s32.totalorder %s2552_s29, 2  ;;  %p48_p5 = scmp.eq.s32.totalorder %s46_s4, 0 }
  0x18   : > { %p63_p6 = scmp.ne.s32.totalorder %s1831_s19, %s1827_s18  ;;  %p64_p7 = scmp.eq.s32.totalorder %s1231_s26, 0 }
  0x19   : > { %s2554_s29 = smov (%p39_p4, %s2552_s29), 0  ;;  %s78_s9 = sadd.s32 1, %s1823_s17 }
  0x1a   : > { %2513 = sst [smem:[#allocation21_spill]] %s2554_s29  ;;  %p1990_p8 = por %p64_p7, %p63_p6 }
  0x1b   : > { %s1988_s6 = scalar_select %p48_p5, %s1835_s20, %s50_s30  }
  0x1c   : > { %s74_s8 = ssub.s32 %s1851_s24, %s2554_s29  ;;  %p85_p10 = scmp.ne.s32.totalorder %s1823_s17, %s1819_s16 }
  0x1d   : > { %2514 = sst [smem:[#allocation22_spill]] %s1988_s6  ;;  %p76_p9 = scmp.eq.s32.totalorder %s74_s8, 0 }
  0x1e   : > { %p91_p11 = scmp.ne.s32.totalorder %s1819_s16, %s1815_s15  ;;  %p2006_p12 = por %p85_p10, %p58_p2 }
  0x1f   : > { %s2002_s10 = scalar_select %p76_p9, %s1823_s17, %s78_s9  }
  0x20   : > { %p2010_p13 = por %p91_p11, %p64_p7  ;;  %s133_s30 = sor.u32 %s74_s8, %s46_s4 }
  0x21   : > { %2516 = sst [smem:[#allocation23_spill]] %s2002_s10  ;;  %s136_s27 = sadd.s32 1, %s1811_s14 }
  0x22   : > { %s2518_s18 = scalar_select %p2010_p13, 1, 0 }
  0x23   : > { %p134_p0 = scmp.eq.s32.totalorder %s133_s30, 0  ;;  %p146_p1 = scmp.ne.s32.totalorder %s1811_s14, %s1807_s13 }
  0x24   : > { %p147_p4 = scmp.eq.s32.totalorder %s1231_s26, 3  ;;  %p152_p5 = scmp.ne.s32.totalorder %s1807_s13, %s1803_s12 }
  0x25   : > { %s2022_s29 = scalar_select %p134_p0, %s1811_s14, %s136_s27  }
  0x26   : > { %p2024_p6 = por %p147_p4, %p146_p1  ;;  %s2521_s9 = sadd.s32 4294967294, %s1855_s25  }
  0x27   : > { %2519 = sst [smem:[#allocation24_spill]] %s2022_s29  ;;  %p153_p2 = scmp.eq.s32.totalorder %s2521_s9, 3 }
  0x28   : > { %s2520_s15 = scalar_select %p2024_p6, 1, 0 }
  0x29   : > { %p2030_p9 = por %p153_p2, %p152_p5  ;;  %p1234_p7 = scmp.ge.s32.totalorder %s1855_s25, 4 }
  0x2b   : > { %s2522_s28 = scalar_select %p2030_p9, 1, 0 }
  0x2c   : > { %169 = sbr.rel (%p1234_p7) target bundleno = 92 (0x5c), region = 16 }
  0x2d   : > { %2523 = sst [smem:[#allocation25_spill]] %s2522_s28 }
  0x33   : > { %s173_s26 = sand.u32 1, %s1835_s20   ;;  %s1548_s27 = smul.u32 6144, %s1847_s23 }
  0x34   : > { %s1547_s4 = smul.u32 768, %s173_s26  ;;  %s1857_s8 = smov 12288  }
  0x35   : > { %1553 = sst [smem:[#allocation9]] (%p1978_p3), %s1857_s8  ;;  %s1858_s12 = smov 6144  }
  0x36   : > { %s1552_s30 = scalar_select %p1978_p3, [#allocation0], [#allocation12] }
  0x37   : > { %s2524_s0 = sld [smem:[#allocation26_spill]]  ;;  %s177_s14 = scalar_lea.vmem [#allocation2], %s1547_s4 }
  0x38   : > { %s190_s29 = sld [smem:[%s1552_s30]]   ;;  %s198_s28 = sshll.u32 %s177_s14, 4  ;;  %s199_s28 = int_to_ptr.vmem [resolvable:$true] %s198_s28 }
  0x39   : > { %1554 = sst [smem:[#allocation9 + $0x1]] (%p1978_p3), %s1858_s12  ;;  %s1859_s23 = smov 8  }
  0x3a   : > { %1555 = sst [smem:[#allocation9 + $0x2]] (%p1978_p3), %s1859_s23  ;;  %s1860_s20 = smov 768  }
  0x3b   : > { %1556 = sst [smem:[#allocation9 + $0x3]] (%p1978_p3), %s1860_s20  ;;  %s1861_s8 = smov 48  }
  0x3c   : > { %1557 = sst [smem:[#allocation9 + $0x4]] (%p1978_p3), %s1860_s20  ;;  %s174_s4 = scalar_lea.sflag [#allocation3], %s173_s26 }
  0x3d   : > { %s185_s10 = scalar_lea.hbm %s2524_s0, %s1548_s27  ;;  %1558 = sst [smem:[#allocation9 + $0x5]] (%p1978_p3), %s1861_s8 }
  0x3e   : > { %s1236_s6 = sshll.u32 %s190_s29, 26  ;;  %s1862_s30 = smov [#allocation8]  }
  0x3f   : > { %s1237_s27 = sadd.s32 134217728, %s1236_s6  ;;  %s221_s12 = sand.u32 1, %s1823_s17  }
  0x40   : > { %1559 = dma.general (%p1978_p3), %s185_s10, 12288, %s199_s28, %s174_s4, %s1862_s30, [#allocation9], %s1237_s27, 0  }
  0x41   : > { %s1238_s14 = sshll.u32 %s1851_s24, 7  ;;  %s1549_s23 = smul.u32 704, %s221_s12 }
  0x42   : > { %s2061_s3 = scalar_lea.hbm %s2493_s1, %s1238_s14  ;;  %s2065_s28 = scalar_lea.sflag [#allocation6], %s221_s12 }
  0x43   : > { %s225_s20 = scalar_lea.vmem [#allocation5], %s1549_s23  ;;  %s1705_s5 = scalar_lea.hbm %s2061_s3, 11264 }
  0x44   : > { %s233_s29 = sshll.u32 %s225_s20, 4  ;;  %p1706_p3 = scmp.ne.s32.totalorder %s2061_s3, %s1705_s5  ;;  %s2063_s29 = int_to_ptr.vmem [resolvable:$true] %s233_s29 }
  0x45   : > { %s1709_s0 = scalar_lea.hbm %s2493_s1, 22528  ;;  %p1710_p0 = scmp.lt.u32.totalorder %s2061_s3, %s2493_s1 }
  0x46   : > { %p1707_p10 = pnand %p1706_p3, %p2006_p12  ;;  %p1711_p1 = scmp.lt.u32.totalorder %s1709_s0, %s1705_s5 }
  0x47   : > { %p1713_p5 = scmp.lt.u32.totalorder %s1705_s5, %s2061_s3 }
  0x48   : > { %p1708_p11 = pneg %p1707_p10  ;;  %p1712_p4 = por %p1711_p1, %p1710_p0 }
  0x4a   : > { %p1714_p2 = por %p1713_p5, %p1712_p4 }
  0x4c   : > { %p1715_p7 = pnand %p1714_p2, %p1708_p11 }
  0x4e   : > { %1718 = shalt.err (!%p1715_p7)
}
  0x4f   : > { %s1719_s27 = scalar_lea.vmem %s2063_s29, 11264  ;;  %s1863_s4 = smov [#allocation5]  }
  0x50   : > { %p1720_p3 = scmp.ne.s32.totalorder %s2063_s29, %s1719_s27  ;;  %s1723_s30 = sshll.u32 %s1863_s4, 4  ;;  %s1724_s30 = int_to_ptr.vmem [resolvable:$false] %s1723_s30 }
  0x51   : > { %s1725_s12 = scalar_lea.vmem %s1724_s30, 22528  ;;  %p1726_p6 = scmp.lt.s32.totalorder %s2063_s29, %s1724_s30 }
  0x52   : > { %p1721_p10 = pnand %p1720_p3, %p2006_p12  ;;  %p1727_p13 = scmp.lt.s32.totalorder %s1725_s12, %s1719_s27 }
  0x54   : > { %p1722_p9 = pneg %p1721_p10  ;;  %p1728_p0 = por %p1727_p13, %p1726_p6 }
  0x56   : > { %p1729_p1 = pnand %p1728_p0, %p1722_p9 }
  0x58   : > { %1732 = shalt.err (!%p1729_p1)
}
  0x59   : > { %s1864_s14 = smov 256   ;;  %s1865_s23 = smov 128  }
  0x5a   : > { %s1866_s9 = smov 8  }
  0x5b   : > { %1560 = dma.hbm_to_vmem [thread:$0]  (%p2006_p12), %s2061_s3, 11264, %s2063_s29, %s2065_s28, %s1864_s14, %s1865_s23, %s1866_s9  }
  0x5c PF: > { %p1239_p11 = scmp.ge.s32.totalorder %s1855_s25, 1  ;;  %p251_p4 = scmp.lt.s32.totalorder %s1855_s25, 5 }
  0x5e   : > { %p252_p5 = pnand %p1239_p11, %p251_p4 }
  0x5f   : > { %s257_s20 = sand.u32 (!%p252_p5), 1, %s1831_s19  }
  0x60   : > { %255 = sbr.rel (%p252_p5) target bundleno = 468 (0x1d4), region = 32  ;;  %s258_s10 = scalar_lea.sflag (!%p252_p5), [#allocation3], %s257_s20 }
  0x61   : > { %s1550_s5 = smul.u32 (!%p252_p5), 768, %s257_s20 }
  0x63   : > { %s2092_s26 = scalar_lea.vmem (!%p252_p5), [#allocation2], %s1550_s5 }
  0x67   : > { %1790 = dma.done.wait (%p1990_p8), %s258_s10, 12288  }
  0x68   : > { %1792 = vsyncadd (%p1990_p8), %s258_s10, 4294955008  ;;  %s266_s3 = sand.u32 1, %s1819_s16   ;;  %p2525_p12 = scmp.ne.s32.totalorder %s2518_s18, 0 }
  0x69   : > { %s1551_s11 = smul.u32 704, %s266_s3  ;;  %s267_s29 = scalar_lea.sflag [#allocation6], %s266_s3 }
  0x6b   : > { %s2099_s28 = scalar_lea.vmem [#allocation5], %s1551_s11 }
  0x6c   : > { %1794 = dma.done.wait (%p2525_p12), %s267_s29, 11264  }
  0x6d   : > { %1796 = vsyncadd (%p2525_p12), %s267_s29, 4294956032  ;;  %v424_v0 = vld [vmem:[%s2099_s28 + $0x80] sm:$0xff]  ;;  %v425_v1 = vld [vmem:[%s2099_s28 + $0x88] sm:$0xff]  ;;  %vm503_vm0 = vcmask 523264   ;;  %s302_s7 = sand.u32 1, %s1807_s13   ;;  %p307_p8 = scmp.lt.s32.totalorder %s1843_s22, 1 }
  0x6e   : > { %v456_v2 = vld [vmem:[%s2099_s28 + $0x180] sm:$0xff]  ;;  %v1423_v3 = vpack.c.bf16 %v425_v1, %v424_v0  ;;  %v457_v4 = vld [vmem:[%s2099_s28 + $0x188] sm:$0xff]  ;;  %v426_v11 = vld [vmem:[%s2099_s28 + $0x90] sm:$0xff]  ;;  %s1240_s27 = sshll.u32 %s302_s7, 7  ;;  %s1052_s30 = scalar_lea.sflag [#allocation4], %s302_s7 }
  0x6f   : > { %v408_v5 = vld [vmem:[%s2099_s28] sm:$0xff]  ;;  %v409_v6 = vld [vmem:[%s2099_s28 + $0x8] sm:$0xff]  ;;  %v1455_v7 = vpack.c.bf16 %v457_v4, %v456_v2  ;;  %v427_v13 = vld [vmem:[%s2099_s28 + $0x98] sm:$0xff]  ;;  %s308_s18 = scalar_select %p307_p8, %s1843_s22, 1 }
  0x70   : > { %v1425_v8 = vpack.c.bf16 %v409_v6, %v408_v5  ;;  %v440_v9 = vld [vmem:[%s2099_s28 + $0x100] sm:$0xff]  ;;  %v441_v10 = vld [vmem:[%s2099_s28 + $0x108] sm:$0xff]  ;;  %1424 = vmatprep.subr.bf16.mxu0 %v1423_v3  ;;  %v458_v14 = vld [vmem:[%s2099_s28 + $0x190] sm:$0xff]  ;;  %v1427_v16 = vpack.c.bf16 %v427_v13, %v426_v11  ;;  %s2387_s4 = scalar_lea.vmem [#allocation7], %s1240_s27 }
  0x71   : > { %v1457_v12 = vpack.c.bf16 %v441_v10, %v440_v9  ;;  %v459_v15 = vld [vmem:[%s2099_s28 + $0x198] sm:$0xff]  ;;  %1456 = vmatprep.subr.bf16.mxu1 %v1455_v7  ;;  %v410_v18 = vld [vmem:[%s2099_s28 + $0x10] sm:$0xff]  ;;  %v428_v23 = vld [vmem:[%s2099_s28 + $0xa0] sm:$0xff]  ;;  %s311_s6 = scalar_lea.vmem %s2494_s2, %s308_s18 }
  0x72   : > { %1426 = vmatpush3.bf16.msra.mxu0 %v1425_v8  ;;  %v1459_v17 = vpack.c.bf16 %v459_v15, %v458_v14  ;;  %v411_v19 = vld [vmem:[%s2099_s28 + $0x18] sm:$0xff]  ;;  %v442_v20 = vld [vmem:[%s2099_s28 + $0x110] sm:$0xff]  ;;  %v429_v24 = vld [vmem:[%s2099_s28 + $0xa8] sm:$0xff] }
  0x73   : > { %1458 = vmatpush3.bf16.msra.mxu1 %v1457_v12  ;;  %v1429_v21 = vpack.c.bf16 %v411_v19, %v410_v18  ;;  %v443_v22 = vld [vmem:[%s2099_s28 + $0x118] sm:$0xff]  ;;  %1428 = vmatprep.subr.bf16.mxu0 %v1427_v16  ;;  %v1431_v26 = vpack.c.bf16 %v429_v24, %v428_v23  ;;  %v460_v27 = vld [vmem:[%s2099_s28 + $0x1a0] sm:$0xff]  ;;  %v461_v28 = vld [vmem:[%s2099_s28 + $0x1a8] sm:$0xff] }
  0x74   : > { %1460 = vmatprep.subr.bf16.mxu1 %v1459_v17  ;;  %v1461_v25 = vpack.c.bf16 %v443_v22, %v442_v20  ;;  %v412_v29 = vld [vmem:[%s2099_s28 + $0x20] sm:$0xff]  ;;  %v1463_v30 = vpack.c.bf16 %v461_v28, %v460_v27  ;;  %v413_v31 = vld [vmem:[%s2099_s28 + $0x28] sm:$0xff]  ;;  %v430_v35 = vld [vmem:[%s2099_s28 + $0xb0] sm:$0xff] }
  0x75   : > { %v444_v32 = vld [vmem:[%s2099_s28 + $0x120] sm:$0xff]  ;;  %v445_v33 = vld [vmem:[%s2099_s28 + $0x128] sm:$0xff]  ;;  %v1433_v34 = vpack.c.bf16 %v413_v31, %v412_v29  ;;  %v431_v36 = vld [vmem:[%s2099_s28 + $0xb8] sm:$0xff] }
  0x76   : > { %1430 = vmatpush3.bf16.msra.mxu0 %v1429_v21  ;;  %v462_v37 = vld [vmem:[%s2099_s28 + $0x1b0] sm:$0xff]  ;;  %v1465_v38 = vpack.c.bf16 %v445_v33, %v444_v32  ;;  %v1435_v39 = vpack.c.bf16 %v431_v36, %v430_v35  ;;  %v463_v40 = vld [vmem:[%s2099_s28 + $0x1b8] sm:$0xff]  ;;  %v432_v46 = vld [vmem:[%s2099_s28 + $0xc0] sm:$0xff] }
  0x77   : > { %1462 = vmatpush3.bf16.msra.mxu1 %v1461_v25  ;;  %1432 = vmatprep.subr.bf16.mxu0 %v1431_v26  ;;  %v414_v41 = vld [vmem:[%s2099_s28 + $0x30] sm:$0xff]  ;;  %v415_v42 = vld [vmem:[%s2099_s28 + $0x38] sm:$0xff]  ;;  %v1467_v43 = vpack.c.bf16 %v463_v40, %v462_v37  ;;  %v433_v47 = vld [vmem:[%s2099_s28 + $0xc8] sm:$0xff] }
  0x78   : > { %1464 = vmatprep.subr.bf16.mxu1 %v1463_v30  ;;  %v446_v44 = vld [vmem:[%s2099_s28 + $0x130] sm:$0xff]  ;;  %v447_v45 = vld [vmem:[%s2099_s28 + $0x138] sm:$0xff]  ;;  %v464_v48 = vld [vmem:[%s2099_s28 + $0x1c0] sm:$0xff]  ;;  %v1437_v50 = vpack.c.bf16 %v415_v42, %v414_v41  ;;  %v1439_v52 = vpack.c.bf16 %v433_v47, %v432_v46 }
  0x79   : > { %v465_v49 = vld [vmem:[%s2099_s28 + $0x1c8] sm:$0xff]  ;;  %v1469_v51 = vpack.c.bf16 %v447_v45, %v446_v44  ;;  %v416_v53 = vld [vmem:[%s2099_s28 + $0x40] sm:$0xff]  ;;  %v434_v58 = vld [vmem:[%s2099_s28 + $0xd0] sm:$0xff] }
  0x7a   : > { %1434 = vmatpush3.bf16.msra.mxu0 %v1433_v34  ;;  %v417_v54 = vld [vmem:[%s2099_s28 + $0x48] sm:$0xff]  ;;  %v448_v55 = vld [vmem:[%s2099_s28 + $0x140] sm:$0xff]  ;;  %v1471_v56 = vpack.c.bf16 %v465_v49, %v464_v48  ;;  %v435_v59 = vld [vmem:[%s2099_s28 + $0xd8] sm:$0xff] }
  0x7b   : > { %1466 = vmatpush3.bf16.msra.mxu1 %v1465_v38  ;;  %1436 = vmatprep.subr.bf16.mxu0 %v1435_v39  ;;  %v449_v57 = vld [vmem:[%s2099_s28 + $0x148] sm:$0xff]  ;;  %v466_v60 = vld [vmem:[%s2099_s28 + $0x1d0] sm:$0xff]  ;;  %v467_v61 = vld [vmem:[%s2099_s28 + $0x1d8] sm:$0xff]  ;;  %v1441_v62 = vpack.c.bf16 %v417_v54, %v416_v53  ;;  %v1443_v0 = vpack.c.bf16 %v435_v59, %v434_v58  ;;  %v1867_v39 = vmov 0.0|0.0  }
  0x7c   : > { %1468 = vmatprep.subr.bf16.mxu1 %v1467_v43  ;;  %v1473_v63 = vpack.c.bf16 %v449_v57, %v448_v55  ;;  %v418_v1 = vld [vmem:[%s2099_s28 + $0x50] sm:$0xff]  ;;  %v419_v2 = vld [vmem:[%s2099_s28 + $0x58] sm:$0xff]  ;;  %v1475_v4 = vpack.c.bf16 %v467_v61, %v466_v60  ;;  %v436_v6 = vld [vmem:[%s2099_s28 + $0xe0] sm:$0xff] }
  0x7d   : > { %v450_v3 = vld [vmem:[%s2099_s28 + $0x150] sm:$0xff]  ;;  %v451_v5 = vld [vmem:[%s2099_s28 + $0x158] sm:$0xff]  ;;  %v437_v7 = vld [vmem:[%s2099_s28 + $0xe8] sm:$0xff]  ;;  %v1445_v10 = vpack.c.bf16 %v419_v2, %v418_v1 }
  0x7e   : > { %1438 = vmatpush3.bf16.msra.mxu0 %v1437_v50  ;;  %v468_v8 = vld [vmem:[%s2099_s28 + $0x1e0] sm:$0xff]  ;;  %v469_v9 = vld [vmem:[%s2099_s28 + $0x1e8] sm:$0xff]  ;;  %v1477_v13 = vpack.c.bf16 %v451_v5, %v450_v3  ;;  %v1447_v14 = vpack.c.bf16 %v437_v7, %v436_v6  ;;  %v315_v17 = vld [vmem:[%s2092_s26 + $0x18] sm:$0xff] }
  0x7f   : > { %1470 = vmatpush3.bf16.msra.mxu1 %v1469_v51  ;;  %1440 = vmatprep.subr.bf16.mxu0 %v1439_v52  ;;  %v420_v11 = vld [vmem:[%s2099_s28 + $0x60] sm:$0xff]  ;;  %v421_v12 = vld [vmem:[%s2099_s28 + $0x68] sm:$0xff]  ;;  %v1479_v18 = vpack.c.bf16 %v469_v9, %v468_v8  ;;  %v438_v20 = vld [vmem:[%s2099_s28 + $0xf0] sm:$0xff] }
  0x80   : > { %1472 = vmatprep.subr.bf16.mxu1 %v1471_v56  ;;  %v452_v15 = vld [vmem:[%s2099_s28 + $0x160] sm:$0xff]  ;;  %v313_v16 = vld [vmem:[%s2092_s26 + $0x8] sm:$0xff]  ;;  %v439_v21 = vld [vmem:[%s2099_s28 + $0xf8] sm:$0xff]  ;;  %761 = vmatprep.mubr.f32.mxu1 %v315_v17  ;;  %v1449_v24 = vpack.c.bf16 %v421_v12, %v420_v11 }
  0x81   : > { %v453_v19 = vld [vmem:[%s2099_s28 + $0x168] sm:$0xff]  ;;  %616 = vmatprep.mubr.f32.mxu0 %v313_v16  ;;  %v470_v22 = vld [vmem:[%s2099_s28 + $0x1f0] sm:$0xff]  ;;  %v471_v23 = vld [vmem:[%s2099_s28 + $0x1f8] sm:$0xff]  ;;  %v1451_v26 = vpack.c.bf16 %v439_v21, %v438_v20 }
  0x82   : > { %1442 = vmatpush3.bf16.msra.mxu0 %v1441_v62  ;;  %v1481_v25 = vpack.c.bf16 %v453_v19, %v452_v15  ;;  %v422_v27 = vld [vmem:[%s2099_s28 + $0x70] sm:$0xff]  ;;  %v423_v28 = vld [vmem:[%s2099_s28 + $0x78] sm:$0xff]  ;;  %v1483_v29 = vpack.c.bf16 %v471_v23, %v470_v22  ;;  %v472_v34 = vld [vmem:[%s2099_s28 + $0x200] sm:$0xff] }
  0x83   : > { %1474 = vmatpush3.bf16.msra.mxu1 %v1473_v63  ;;  %1444 = vmatprep.subr.bf16.mxu0 %v1443_v0  ;;  %v454_v30 = vld [vmem:[%s2099_s28 + $0x170] sm:$0xff]  ;;  %v455_v31 = vld [vmem:[%s2099_s28 + $0x178] sm:$0xff]  ;;  %v1453_v32 = vpack.c.bf16 %v423_v28, %v422_v27  ;;  %v473_v35 = vld [vmem:[%s2099_s28 + $0x208] sm:$0xff] }
  0x84   : > { %1476 = vmatprep.subr.bf16.mxu1 %v1475_v4  ;;  %v1485_v33 = vpack.c.bf16 %v455_v31, %v454_v30  ;;  %v312_v36 = vld [vmem:[%s2092_s26] sm:$0xff]  ;;  %v1488_v37 = vpack.c.bf16 %v473_v35, %v472_v34  ;;  %v314_v38 = vld [vmem:[%s2092_s26 + $0x10] sm:$0xff]  ;;  %v319_v40 = vld [vmem:[%s2092_s26 + $0x38] sm:$0xff] }
  0x85   : > { %v474_v41 = vld [vmem:[%s2099_s28 + $0x210] sm:$0xff]  ;;  %v475_v42 = vld [vmem:[%s2099_s28 + $0x218] sm:$0xff]  ;;  %v321_v43 = vld [vmem:[%s2092_s26 + $0x48] sm:$0xff] }
  0x86   : > { %1446 = vmatpush3.bf16.msra.mxu0 %v1445_v10  ;;  %v318_v44 = vld [vmem:[%s2092_s26 + $0x30] sm:$0xff]  ;;  %v320_v45 = vld [vmem:[%s2092_s26 + $0x40] sm:$0xff]  ;;  %v325_v46 = vld [vmem:[%s2092_s26 + $0x68] sm:$0xff]  ;;  %v1491_v47 = vpack.c.bf16 %v475_v42, %v474_v41 }
  0x87   : > { %1478 = vmatpush3.bf16.msra.mxu1 %v1477_v13  ;;  %1448 = vmatprep.subr.bf16.mxu0 %v1447_v14  ;;  %v327_v48 = vld [vmem:[%s2092_s26 + $0x78] sm:$0xff]  ;;  %v476_v49 = vld [vmem:[%s2099_s28 + $0x220] sm:$0xff]  ;;  %v477_v50 = vld [vmem:[%s2099_s28 + $0x228] sm:$0xff] }
  0x88   : > { %1480 = vmatprep.subr.bf16.mxu1 %v1479_v18  ;;  %v324_v51 = vld [vmem:[%s2092_s26 + $0x60] sm:$0xff]  ;;  %v326_v52 = vld [vmem:[%s2092_s26 + $0x70] sm:$0xff]  ;;  %v331_v53 = vld [vmem:[%s2092_s26 + $0x98] sm:$0xff]  ;;  %v1494_v54 = vpack.c.bf16 %v477_v50, %v476_v49 }
  0x89   : > { %v333_v55 = vld [vmem:[%s2092_s26 + $0xa8] sm:$0xff]  ;;  %v478_v56 = vld [vmem:[%s2099_s28 + $0x230] sm:$0xff]  ;;  %v479_v57 = vld [vmem:[%s2099_s28 + $0x238] sm:$0xff] }
  0x8a   : > { %1450 = vmatpush3.bf16.msra.mxu0 %v1449_v24  ;;  %v330_v58 = vld [vmem:[%s2092_s26 + $0x90] sm:$0xff]  ;;  %v332_v59 = vld [vmem:[%s2092_s26 + $0xa0] sm:$0xff]  ;;  %v337_v60 = vld [vmem:[%s2092_s26 + $0xc8] sm:$0xff]  ;;  %v1497_v61 = vpack.c.bf16 %v479_v57, %v478_v56 }
  0x8b   : > { %1482 = vmatpush3.bf16.msra.mxu1 %v1481_v25  ;;  %1452 = vmatprep.subr.bf16.mxu0 %v1451_v26  ;;  %v339_v62 = vld [vmem:[%s2092_s26 + $0xd8] sm:$0xff]  ;;  %v480_v63 = vld [vmem:[%s2099_s28 + $0x240] sm:$0xff]  ;;  %v481_v0 = vld [vmem:[%s2099_s28 + $0x248] sm:$0xff] }
  0x8c   : > { %1484 = vmatprep.subr.bf16.mxu1 %v1483_v29  ;;  %v336_v1 = vld [vmem:[%s2092_s26 + $0xc0] sm:$0xff]  ;;  %v338_v2 = vld [vmem:[%s2092_s26 + $0xd0] sm:$0xff]  ;;  %v343_v3 = vld [vmem:[%s2092_s26 + $0xf8] sm:$0xff]  ;;  %v1500_v4 = vpack.c.bf16 %v481_v0, %v480_v63 }
  0x8d   : > { %v345_v5 = vld [vmem:[%s2092_s26 + $0x108] sm:$0xff]  ;;  %v482_v6 = vld [vmem:[%s2099_s28 + $0x250] sm:$0xff]  ;;  %v483_v7 = vld [vmem:[%s2099_s28 + $0x258] sm:$0xff] }
  0x8e   : > { %1454 = vmatpush3.bf16.msra.mxu0 %v1453_v32  ;;  %v342_v8 = vld [vmem:[%s2092_s26 + $0xf0] sm:$0xff]  ;;  %v344_v9 = vld [vmem:[%s2092_s26 + $0x100] sm:$0xff]  ;;  %v349_v10 = vld [vmem:[%s2092_s26 + $0x128] sm:$0xff]  ;;  %v1503_v11 = vpack.c.bf16 %v483_v7, %v482_v6 }
  0x8f   : > { %1486 = vmatpush3.bf16.msra.mxu1 %v1485_v33  ;;  %1487 = vmatprep.subr.bf16.mxu0 %v1867_v39  ;;  %v351_v12 = vld [vmem:[%s2092_s26 + $0x138] sm:$0xff]  ;;  %v484_v13 = vld [vmem:[%s2099_s28 + $0x260] sm:$0xff]  ;;  %v485_v14 = vld [vmem:[%s2099_s28 + $0x268] sm:$0xff] }
  0x90   : > { %1523 = vmatprep.subr.bf16.mxu1 %v1867_v39  ;;  %v348_v15 = vld [vmem:[%s2092_s26 + $0x120] sm:$0xff]  ;;  %v350_v16 = vld [vmem:[%s2092_s26 + $0x130] sm:$0xff]  ;;  %v355_v17 = vld [vmem:[%s2092_s26 + $0x158] sm:$0xff]  ;;  %v1506_v18 = vpack.c.bf16 %v485_v14, %v484_v13 }
  0x91   : > { %617 = vmatmul.mubr.f32.vlgmr.msra.gmra.mrb[0].mxu0 %v312_v36  ;;  %v357_v19 = vld [vmem:[%s2092_s26 + $0x168] sm:$0xff]  ;;  %v486_v20 = vld [vmem:[%s2099_s28 + $0x270] sm:$0xff]  ;;  %v487_v21 = vld [vmem:[%s2099_s28 + $0x278] sm:$0xff] }
  0x92   : > { %762 = vmatmul.mubr.f32.vlgmr.msra.gmra.mrb[0].mxu1 %v314_v38  ;;  %1489 = vmatpush1.bf16.msra.mxu0 %v1488_v37  ;;  %v354_v22 = vld [vmem:[%s2092_s26 + $0x150] sm:$0xff]  ;;  %v356_v23 = vld [vmem:[%s2092_s26 + $0x160] sm:$0xff]  ;;  %v361_v24 = vld [vmem:[%s2092_s26 + $0x188] sm:$0xff]  ;;  %v1509_v25 = vpack.c.bf16 %v487_v21, %v486_v20 }
  0x93   : > { %1535 = vmatpush1.bf16.msra.mxu1 %v1488_v37  ;;  %621 = vmatprep.mubr.f32.mxu0 %v319_v40  ;;  %v363_v26 = vld [vmem:[%s2092_s26 + $0x198] sm:$0xff]  ;;  %v488_v27 = vld [vmem:[%s2099_s28 + $0x280] sm:$0xff]  ;;  %v489_v28 = vld [vmem:[%s2099_s28 + $0x288] sm:$0xff] }
  0x94   : > { %766 = vmatprep.mubr.f32.mxu1 %v321_v43  ;;  %1490 = vmatprep.subr.bf16.mxu0 %v1867_v39  ;;  %v360_v29 = vld [vmem:[%s2092_s26 + $0x180] sm:$0xff]  ;;  %v362_v30 = vld [vmem:[%s2092_s26 + $0x190] sm:$0xff]  ;;  %v367_v31 = vld [vmem:[%s2092_s26 + $0x1b8] sm:$0xff]  ;;  %v1512_v32 = vpack.c.bf16 %v489_v28, %v488_v27 }
  0x95   : > { %622 = vmatmul.mubr.f32.gmra.mrb[2].mxu0 %v318_v44  ;;  %1524 = vmatprep.subr.bf16.mxu1 %v1867_v39  ;;  %v369_v33 = vld [vmem:[%s2092_s26 + $0x1c8] sm:$0xff]  ;;  %v490_v34 = vld [vmem:[%s2099_s28 + $0x290] sm:$0xff]  ;;  %v491_v35 = vld [vmem:[%s2099_s28 + $0x298] sm:$0xff] }
  0x96   : > { %767 = vmatmul.mubr.f32.gmra.mrb[2].mxu1 %v320_v45  ;;  %626 = vmatprep.mubr.f32.mxu0 %v325_v46  ;;  %v366_v36 = vld [vmem:[%s2092_s26 + $0x1b0] sm:$0xff]  ;;  %v368_v37 = vld [vmem:[%s2092_s26 + $0x1c0] sm:$0xff]  ;;  %v373_v38 = vld [vmem:[%s2092_s26 + $0x1e8] sm:$0xff]  ;;  %v1515_v40 = vpack.c.bf16 %v491_v35, %v490_v34 }
  0x97   : > { %771 = vmatprep.mubr.f32.mxu1 %v327_v48  ;;  %1492 = vmatpush1.bf16.msra.mxu0 %v1491_v47  ;;  %v375_v41 = vld [vmem:[%s2092_s26 + $0x1f8] sm:$0xff]  ;;  %v492_v42 = vld [vmem:[%s2099_s28 + $0x2a0] sm:$0xff]  ;;  %v493_v43 = vld [vmem:[%s2099_s28 + $0x2a8] sm:$0xff] }
  0x98   : > { %1536 = vmatpush1.bf16.msra.mxu1 %v1491_v47  ;;  %1493 = vmatprep.subr.bf16.mxu0 %v1867_v39  ;;  %v372_v44 = vld [vmem:[%s2092_s26 + $0x1e0] sm:$0xff]  ;;  %v374_v45 = vld [vmem:[%s2092_s26 + $0x1f0] sm:$0xff]  ;;  %v379_v46 = vld [vmem:[%s2092_s26 + $0x218] sm:$0xff]  ;;  %v1518_v47 = vpack.c.bf16 %v493_v43, %v492_v42 }
  0x99   : > { %627 = vmatmul.mubr.f32.gmra.mrb[4].mxu0 %v324_v51  ;;  %1525 = vmatprep.subr.bf16.mxu1 %v1867_v39  ;;  %v381_v48 = vld [vmem:[%s2092_s26 + $0x228] sm:$0xff]  ;;  %v494_v49 = vld [vmem:[%s2099_s28 + $0x2b0] sm:$0xff]  ;;  %v495_v50 = vld [vmem:[%s2099_s28 + $0x2b8] sm:$0xff] }
  0x9a   : > { %772 = vmatmul.mubr.f32.gmra.mrb[4].mxu1 %v326_v52  ;;  %631 = vmatprep.mubr.f32.mxu0 %v331_v53  ;;  %v378_v51 = vld [vmem:[%s2092_s26 + $0x210] sm:$0xff]  ;;  %v380_v52 = vld [vmem:[%s2092_s26 + $0x220] sm:$0xff]  ;;  %v385_v53 = vld [vmem:[%s2092_s26 + $0x248] sm:$0xff] }
  0x9b   : > { %776 = vmatprep.mubr.f32.mxu1 %v333_v55  ;;  %1495 = vmatpush1.bf16.msra.mxu0 %v1494_v54  ;;  %v387_v55 = vld [vmem:[%s2092_s26 + $0x258] sm:$0xff]  ;;  %v384_v56 = vld [vmem:[%s2092_s26 + $0x240] sm:$0xff]  ;;  %v386_v57 = vld [vmem:[%s2092_s26 + $0x250] sm:$0xff] }
  0x9c   : > { %1537 = vmatpush1.bf16.msra.mxu1 %v1494_v54  ;;  %1496 = vmatprep.subr.bf16.mxu0 %v1867_v39  ;;  %v1521_v54 = vpack.c.bf16 %v495_v50, %v494_v49  ;;  %v396_v63 = vld [vmem:[%s2092_s26 + $0x2a0] sm:$0xff]  ;;  %v398_v0 = vld [vmem:[%s2092_s26 + $0x2b0] sm:$0xff]  ;;  %v365_v6 = vld [vmem:[%s2092_s26 + $0x1a8] sm:$0xff] }
  0x9d   : > { %632 = vmatmul.mubr.f32.gmra.mrb[6].mxu0 %v330_v58  ;;  %1526 = vmatprep.subr.bf16.mxu1 %v1867_v39  ;;  %v391_v58 = vld [vmem:[%s2092_s26 + $0x278] sm:$0xff]  ;;  %v316_v7 = vld [vmem:[%s2092_s26 + $0x20] sm:$0xff]  ;;  %v329_v13 = vld [vmem:[%s2092_s26 + $0x88] sm:$0xff] }
  0x9e   : > { %777 = vmatmul.mubr.f32.gmra.mrb[6].mxu1 %v332_v59  ;;  %636 = vmatprep.mubr.f32.mxu0 %v337_v60  ;;  %v393_v59 = vld [vmem:[%s2092_s26 + $0x288] sm:$0xff]  ;;  %v390_v60 = vld [vmem:[%s2092_s26 + $0x270] sm:$0xff]  ;;  %v407_v34 = vld [vmem:[%s2092_s26 + $0x2f8] sm:$0xff] }
  0x9f   : > { %781 = vmatprep.mubr.f32.mxu1 %v339_v62  ;;  %1498 = vmatpush1.bf16.msra.mxu0 %v1497_v61  ;;  %v399_v62 = vld [vmem:[%s2092_s26 + $0x2b8] sm:$0xff]  ;;  %v377_v14 = vld [vmem:[%s2092_s26 + $0x208] sm:$0xff]  ;;  %v382_v20 = vld [vmem:[%s2092_s26 + $0x230] sm:$0xff] }
  0xa0   : > { %1538 = vmatpush1.bf16.msra.mxu1 %v1497_v61  ;;  %1499 = vmatprep.subr.bf16.mxu0 %v1867_v39  ;;  %v397_v61 = vld [vmem:[%s2092_s26 + $0x2a8] sm:$0xff]  ;;  %v346_v27 = vld [vmem:[%s2092_s26 + $0x110] sm:$0xff] }
  0xa1   : > { %637 = vmatmul.mubr.f32.gmra.mrb[8].mxu0 %v336_v1  ;;  %1527 = vmatprep.subr.bf16.mxu1 %v1867_v39  ;;  %v403_v1 = vld [vmem:[%s2092_s26 + $0x2d8] sm:$0xff]  ;;  %v341_v21 = vld [vmem:[%s2092_s26 + $0xe8] sm:$0xff]  ;;  %v394_v28 = vld [vmem:[%s2092_s26 + $0x290] sm:$0xff] }
  0xa2   : > { %782 = vmatmul.mubr.f32.gmra.mrb[8].mxu1 %v338_v2  ;;  %641 = vmatprep.mubr.f32.mxu0 %v343_v3  ;;  %v405_v2 = vld [vmem:[%s2092_s26 + $0x2e8] sm:$0xff]  ;;  %v402_v3 = vld [vmem:[%s2092_s26 + $0x2d0] sm:$0xff] }
  0xa3   : > { %786 = vmatprep.mubr.f32.mxu1 %v345_v5  ;;  %1501 = vmatpush1.bf16.msra.mxu0 %v1500_v4  ;;  %v317_v5 = vld [vmem:[%s2092_s26 + $0x28] sm:$0xff]  ;;  %v358_v35 = vld [vmem:[%s2092_s26 + $0x170] sm:$0xff] }
  0xa4   : > { %1539 = vmatpush1.bf16.msra.mxu1 %v1500_v4  ;;  %1502 = vmatprep.subr.bf16.mxu0 %v1867_v39  ;;  %v404_v4 = vld [vmem:[%s2092_s26 + $0x2e0] sm:$0xff] }
  0xa5   : > { %642 = vmatmul.mubr.f32.gmra.mrb[10].mxu0 %v342_v8  ;;  %1528 = vmatprep.subr.bf16.mxu1 %v1867_v39  ;;  %v364_v8 = vld [vmem:[%s2092_s26 + $0x1a0] sm:$0xff] }
  0xa6   : > { %787 = vmatmul.mubr.f32.gmra.mrb[10].mxu1 %v344_v9  ;;  %646 = vmatprep.mubr.f32.mxu0 %v349_v10  ;;  %v323_v9 = vld [vmem:[%s2092_s26 + $0x58] sm:$0xff] }
  0xa7   : > { %791 = vmatprep.mubr.f32.mxu1 %v351_v12  ;;  %1504 = vmatpush1.bf16.msra.mxu0 %v1503_v11  ;;  %v371_v10 = vld [vmem:[%s2092_s26 + $0x1d8] sm:$0xff]  ;;  %v370_v12 = vld [vmem:[%s2092_s26 + $0x1d0] sm:$0xff] }
  0xa8   : > { %1540 = vmatpush1.bf16.msra.mxu1 %v1503_v11  ;;  %1505 = vmatprep.subr.bf16.mxu0 %v1867_v39  ;;  %v322_v11 = vld [vmem:[%s2092_s26 + $0x50] sm:$0xff] }
  0xa9   : > { %647 = vmatmul.mubr.f32.gmra.mrb[12].mxu0 %v348_v15  ;;  %1529 = vmatprep.subr.bf16.mxu1 %v1867_v39  ;;  %v328_v15 = vld [vmem:[%s2092_s26 + $0x80] sm:$0xff] }
  0xaa   : > { %792 = vmatmul.mubr.f32.gmra.mrb[12].mxu1 %v350_v16  ;;  %651 = vmatprep.mubr.f32.mxu0 %v355_v17  ;;  %v376_v16 = vld [vmem:[%s2092_s26 + $0x200] sm:$0xff]  ;;  %v335_v17 = vld [vmem:[%s2092_s26 + $0xb8] sm:$0xff] }
  0xab   : > { %796 = vmatprep.mubr.f32.mxu1 %v357_v19  ;;  %1507 = vmatpush1.bf16.msra.mxu0 %v1506_v18  ;;  %v334_v19 = vld [vmem:[%s2092_s26 + $0xb0] sm:$0xff] }
  0xac   : > { %1541 = vmatpush1.bf16.msra.mxu1 %v1506_v18  ;;  %1508 = vmatprep.subr.bf16.mxu0 %v1867_v39  ;;  %v383_v18 = vld [vmem:[%s2092_s26 + $0x238] sm:$0xff] }
  0xad   : > { %652 = vmatmul.mubr.f32.gmra.mrb[14].mxu0 %v354_v22  ;;  %1530 = vmatprep.subr.bf16.mxu1 %v1867_v39  ;;  %v389_v22 = vld [vmem:[%s2092_s26 + $0x268] sm:$0xff] }
  0xae   : > { %797 = vmatmul.mubr.f32.gmra.mrb[14].mxu1 %v356_v23  ;;  %656 = vmatprep.mubr.f32.mxu0 %v361_v24  ;;  %v340_v23 = vld [vmem:[%s2092_s26 + $0xe0] sm:$0xff] }
  0xaf   : > { %801 = vmatprep.mubr.f32.mxu1 %v363_v26  ;;  %1510 = vmatpush1.bf16.msra.mxu0 %v1509_v25  ;;  %v388_v24 = vld [vmem:[%s2092_s26 + $0x260] sm:$0xff]  ;;  %v395_v26 = vld [vmem:[%s2092_s26 + $0x298] sm:$0xff] }
  0xb0   : > { %1542 = vmatpush1.bf16.msra.mxu1 %v1509_v25  ;;  %1511 = vmatprep.subr.bf16.mxu0 %v1867_v39  ;;  %v347_v25 = vld [vmem:[%s2092_s26 + $0x118] sm:$0xff] }
  0xb1   : > { %657 = vmatmul.mubr.f32.gmra.mrb[16].mxu0 %v360_v29  ;;  %1531 = vmatprep.subr.bf16.mxu1 %v1867_v39  ;;  %v353_v29 = vld [vmem:[%s2092_s26 + $0x148] sm:$0xff] }
  0xb2   : > { %802 = vmatmul.mubr.f32.gmra.mrb[16].mxu1 %v362_v30  ;;  %661 = vmatprep.mubr.f32.mxu0 %v367_v31  ;;  %v401_v30 = vld [vmem:[%s2092_s26 + $0x2c8] sm:$0xff]  ;;  %v352_v31 = vld [vmem:[%s2092_s26 + $0x140] sm:$0xff] }
  0xb3   : > { %806 = vmatprep.mubr.f32.mxu1 %v369_v33  ;;  %1513 = vmatpush1.bf16.msra.mxu0 %v1512_v32  ;;  %v359_v33 = vld [vmem:[%s2092_s26 + $0x178] sm:$0xff] }
  0xb4   : > { %1543 = vmatpush1.bf16.msra.mxu1 %v1512_v32  ;;  %1514 = vmatprep.subr.bf16.mxu0 %v1867_v39  ;;  %v400_v32 = vld [vmem:[%s2092_s26 + $0x2c0] sm:$0xff] }
  0xb5   : > { %662 = vmatmul.mubr.f32.gmra.mrb[18].mxu0 %v366_v36  ;;  %1532 = vmatprep.subr.bf16.mxu1 %v1867_v39  ;;  %v406_v36 = vld [vmem:[%s2092_s26 + $0x2f0] sm:$0xff] }
  0xb6   : > { %807 = vmatmul.mubr.f32.gmra.mrb[18].mxu1 %v368_v37  ;;  %666 = vmatprep.mubr.f32.mxu0 %v373_v38 }
  0xb7   : > { %811 = vmatprep.mubr.f32.mxu1 %v375_v41  ;;  %1516 = vmatpush1.bf16.msra.mxu0 %v1515_v40 }
  0xb8   : > { %1544 = vmatpush1.bf16.msra.mxu1 %v1515_v40  ;;  %1517 = vmatprep.subr.bf16.mxu0 %v1867_v39  ;;  %v2335_v40 = vld [vmem:[%s311_s6] ss:$0 sm:$0xff] }
  0xb9   : > { %667 = vmatmul.mubr.f32.gmra.mrb[20].mxu0 %v372_v44  ;;  %1533 = vmatprep.subr.bf16.mxu1 %v1867_v39 }
  0xba   : > { %812 = vmatmul.mubr.f32.gmra.mrb[20].mxu1 %v374_v45  ;;  %671 = vmatprep.mubr.f32.mxu0 %v379_v46 }
  0xbb   : > { %816 = vmatprep.mubr.f32.mxu1 %v381_v48  ;;  %1519 = vmatpush1.bf16.msra.mxu0 %v1518_v47 }
  0xbc   : > { %1545 = vmatpush1.bf16.msra.mxu1 %v1518_v47  ;;  %1520 = vmatprep.subr.bf16.mxu0 %v1867_v39 }
  0xbd   : > { %672 = vmatmul.mubr.f32.gmra.mrb[22].mxu0 %v378_v51  ;;  %1534 = vmatprep.subr.bf16.mxu1 %v1867_v39  ;;  %v392_v39 = vld [vmem:[%s2092_s26 + $0x280] sm:$0xff] }
  0xbe   : > { %817 = vmatmul.mubr.f32.gmra.mrb[22].mxu1 %v380_v52  ;;  %676 = vmatprep.mubr.f32.mxu0 %v385_v53 }
  0xbf   : > { %821 = vmatprep.mubr.f32.mxu1 %v387_v55  ;;  %1522 = vmatpush1.bf16.msra.mxu0 %v1521_v54 }
  0xc0   : > { %1546 = vmatpush1.bf16.msra.mxu1 %v1521_v54 }
  0xc1   : > { %677 = vmatmul.mubr.f32.gmra.mrb[24].mxu0 %v384_v56 }
  0xc2   : > { %822 = vmatmul.mubr.f32.gmra.mrb[24].mxu1 %v386_v57  ;;  %681 = vmatprep.mubr.f32.mxu0 %v391_v58 }
  0xc3   : > { %826 = vmatprep.mubr.f32.mxu1 %v393_v59 }
  0xc5   : > { %682 = vmatmul.mubr.f32.gmra.mrb[26].mxu0 %v390_v60 }
  0xc6   : > { %827 = vmatmul.mubr.f32.gmra.mrb[26].mxu1 %v392_v39  ;;  %686 = vmatprep.mubr.f32.mxu0 %v397_v61 }
  0xc7   : > { %831 = vmatprep.mubr.f32.mxu1 %v399_v62 }
  0xc9   : > { %687 = vmatmul.mubr.f32.gmra.mrb[28].mxu0 %v396_v63 }
  0xca   : > { %832 = vmatmul.mubr.f32.gmra.mrb[28].mxu1 %v398_v0  ;;  %691 = vmatprep.mubr.f32.mxu0 %v403_v1 }
  0xcb   : > { %836 = vmatprep.mubr.f32.mxu1 %v405_v2 }
  0xcd   : > { %692 = vmatmul.mubr.f32.gmra.mrb[30].mxu0 %v402_v3 }
  0xce   : > { %837 = vmatmul.mubr.f32.gmra.mrb[30].mxu1 %v404_v4  ;;  %1242 = vmatprep.mubr.msk.f32.mxu0 %vm503_vm0, %v317_v5 }
  0xcf   : > { %1250 = vmatprep.mubr.msk.f32.mxu1 %vm503_vm0, %v365_v6 }
  0xd1   : > { %907 = vmatmul.mubr.f32.vlgmr.msra.gmra.mrb[32].mxu0 %v316_v7 }
  0xd2   : > { %947 = vmatmul.mubr.f32.vlgmr.msra.gmra.mrb[32].mxu1 %v364_v8  ;;  %1243 = vmatprep.mubr.msk.f32.mxu0 %vm503_vm0, %v323_v9 }
  0xd3   : > { %1251 = vmatprep.mubr.msk.f32.mxu1 %vm503_vm0, %v371_v10 }
  0xd5   : > { %912 = vmatmul.mubr.f32.gmra.mrb[34].mxu0 %v322_v11 }
  0xd6   : > { %952 = vmatmul.mubr.f32.gmra.mrb[34].mxu1 %v370_v12  ;;  %1244 = vmatprep.mubr.msk.f32.mxu0 %vm503_vm0, %v329_v13 }
  0xd7   : > { %1252 = vmatprep.mubr.msk.f32.mxu1 %vm503_vm0, %v377_v14 }
  0xd9   : > { %917 = vmatmul.mubr.f32.gmra.mrb[36].mxu0 %v328_v15 }
  0xda   : > { %957 = vmatmul.mubr.f32.gmra.mrb[36].mxu1 %v376_v16  ;;  %1245 = vmatprep.mubr.msk.f32.mxu0 %vm503_vm0, %v335_v17 }
  0xdb   : > { %1253 = vmatprep.mubr.msk.f32.mxu1 %vm503_vm0, %v383_v18 }
  0xdd   : > { %922 = vmatmul.mubr.f32.gmra.mrb[38].mxu0 %v334_v19 }
  0xde   : > { %962 = vmatmul.mubr.f32.gmra.mrb[38].mxu1 %v382_v20  ;;  %1246 = vmatprep.mubr.msk.f32.mxu0 %vm503_vm0, %v341_v21 }
  0xdf   : > { %1254 = vmatprep.mubr.msk.f32.mxu1 %vm503_vm0, %v389_v22 }
  0xe1   : > { %927 = vmatmul.mubr.f32.gmra.mrb[40].mxu0 %v340_v23 }
  0xe2   : > { %967 = vmatmul.mubr.f32.gmra.mrb[40].mxu1 %v388_v24  ;;  %1247 = vmatprep.mubr.msk.f32.mxu0 %vm503_vm0, %v347_v25 }
  0xe3   : > { %1255 = vmatprep.mubr.msk.f32.mxu1 %vm503_vm0, %v395_v26 }
  0xe5   : > { %932 = vmatmul.mubr.f32.gmra.mrb[42].mxu0 %v346_v27 }
  0xe6   : > { %972 = vmatmul.mubr.f32.gmra.mrb[42].mxu1 %v394_v28  ;;  %1248 = vmatprep.mubr.msk.f32.mxu0 %vm503_vm0, %v353_v29 }
  0xe7   : > { %1256 = vmatprep.mubr.msk.f32.mxu1 %vm503_vm0, %v401_v30 }
  0xe9   : > { %937 = vmatmul.mubr.f32.gmra.mrb[44].mxu0 %v352_v31 }
  0xea   : > { %977 = vmatmul.mubr.f32.gmra.mrb[44].mxu1 %v400_v32  ;;  %1249 = vmatprep.mubr.msk.f32.mxu0 %vm503_vm0, %v359_v33 }
  0xeb   : > { %1257 = vmatprep.mubr.msk.f32.mxu1 %vm503_vm0, %v407_v34 }
  0xed   : > { %942 = vmatmul.mubr.f32.gmra.mrb[46].mxu0 %v358_v35 }
  0xee   : > { %982 = vmatmul.mubr.f32.gmra.mrb[46].mxu1 %v406_v36 }
 0x164   : > { %v1295_v37 = vpop.f32.mrb[0].mxu0 }
 0x165   : > { %v1375_v38 = vpop.f32.mrb[0].mxu1  ;;  %v1296_v41 = vpop.f32.mrb[1].mxu0 }
 0x166   : > { %v1297_v42 = vadd.f32 %v1296_v41, %v1295_v37  ;;  %v1376_v43 = vpop.f32.mrb[1].mxu1 }
 0x167   : > { %v1377_v44 = vadd.f32 %v1376_v43, %v1375_v38 }
 0x168   : > { %v619_v45 = vadd.f32 %v1297_v42, %v2335_v40  ;;  %v1298_v46 = vpop.f32.mrb[2].mxu0 }
 0x169   : > { %v1378_v47 = vpop.f32.mrb[2].mxu1  ;;  %v1299_v48 = vpop.f32.mrb[3].mxu0 }
 0x16a   : > { %v1300_v49 = vadd.f32 %v1299_v48, %v1298_v46  ;;  %v1379_v50 = vpop.f32.mrb[3].mxu1  ;;  %v2338_v51 = vadd.f32 %v1377_v44, %v619_v45 }
 0x16b   : > { %v1380_v52 = vadd.f32 %v1379_v50, %v1378_v47 }
 0x16c   : > { %v624_v53 = vadd.f32 %v1300_v49, %v2335_v40  ;;  %v1301_v54 = vpop.f32.mrb[4].mxu0 }
 0x16d   : > { %v1381_v55 = vpop.f32.mrb[4].mxu1  ;;  %v1302_v56 = vpop.f32.mrb[5].mxu0 }
 0x16e   : > { %v1303_v57 = vadd.f32 %v1302_v56, %v1301_v54  ;;  %v1382_v58 = vpop.f32.mrb[5].mxu1  ;;  %v2341_v59 = vadd.f32 %v1380_v52, %v624_v53 }
 0x16f   : > { %v1383_v60 = vadd.f32 %v1382_v58, %v1381_v55 }
 0x170   : > { %v629_v39 = vadd.f32 %v1303_v57, %v2335_v40  ;;  %v1304_v61 = vpop.f32.mrb[6].mxu0 }
 0x171   : > { %v1384_v62 = vpop.f32.mrb[6].mxu1  ;;  %v1305_v63 = vpop.f32.mrb[7].mxu0 }
 0x172   : > { %v1306_v0 = vadd.f32 %v1305_v63, %v1304_v61  ;;  %v1385_v1 = vpop.f32.mrb[7].mxu1  ;;  %v2344_v2 = vadd.f32 %v1383_v60, %v629_v39 }
 0x173   : > { %v1386_v3 = vadd.f32 %v1385_v1, %v1384_v62 }
 0x174   : > { %v634_v4 = vadd.f32 %v1306_v0, %v2335_v40  ;;  %v1307_v5 = vpop.f32.mrb[8].mxu0 }
 0x175   : > { %v1387_v6 = vpop.f32.mrb[8].mxu1  ;;  %v1308_v7 = vpop.f32.mrb[9].mxu0 }
 0x176   : > { %v1309_v8 = vadd.f32 %v1308_v7, %v1307_v5  ;;  %v1388_v9 = vpop.f32.mrb[9].mxu1  ;;  %v2347_v10 = vadd.f32 %v1386_v3, %v634_v4 }
 0x177   : > { %v1389_v11 = vadd.f32 %v1388_v9, %v1387_v6 }
 0x178   : > { %v639_v12 = vadd.f32 %v1309_v8, %v2335_v40  ;;  %v1310_v13 = vpop.f32.mrb[10].mxu0 }
 0x179   : > { %v1390_v14 = vpop.f32.mrb[10].mxu1  ;;  %v1311_v15 = vpop.f32.mrb[11].mxu0 }
 0x17a   : > { %v1312_v16 = vadd.f32 %v1311_v15, %v1310_v13  ;;  %v1391_v17 = vpop.f32.mrb[11].mxu1  ;;  %v2350_v18 = vadd.f32 %v1389_v11, %v639_v12 }
 0x17b   : > { %v1392_v19 = vadd.f32 %v1391_v17, %v1390_v14 }
 0x17c   : > { %v644_v20 = vadd.f32 %v1312_v16, %v2335_v40  ;;  %v1313_v21 = vpop.f32.mrb[12].mxu0 }
 0x17d   : > { %v1393_v22 = vpop.f32.mrb[12].mxu1  ;;  %v1314_v23 = vpop.f32.mrb[13].mxu0 }
 0x17e   : > { %v1315_v24 = vadd.f32 %v1314_v23, %v1313_v21  ;;  %v1394_v25 = vpop.f32.mrb[13].mxu1  ;;  %v2353_v26 = vadd.f32 %v1392_v19, %v644_v20 }
 0x17f   : > { %v1395_v27 = vadd.f32 %v1394_v25, %v1393_v22 }
 0x180   : > { %v649_v28 = vadd.f32 %v1315_v24, %v2335_v40  ;;  %v1316_v29 = vpop.f32.mrb[14].mxu0 }
 0x181   : > { %v1396_v30 = vpop.f32.mrb[14].mxu1  ;;  %v1317_v31 = vpop.f32.mrb[15].mxu0 }
 0x182   : > { %v1318_v32 = vadd.f32 %v1317_v31, %v1316_v29  ;;  %v1397_v33 = vpop.f32.mrb[15].mxu1  ;;  %v2356_v34 = vadd.f32 %v1395_v27, %v649_v28 }
 0x183   : > { %v1398_v35 = vadd.f32 %v1397_v33, %v1396_v30 }
 0x184   : > { %v654_v36 = vadd.f32 %v1318_v32, %v2335_v40  ;;  %v1319_v37 = vpop.f32.mrb[16].mxu0 }
 0x185   : > { %v1399_v38 = vpop.f32.mrb[16].mxu1  ;;  %v1320_v41 = vpop.f32.mrb[17].mxu0 }
 0x186   : > { %v1321_v42 = vadd.f32 %v1320_v41, %v1319_v37  ;;  %v1400_v43 = vpop.f32.mrb[17].mxu1  ;;  %v2359_v44 = vadd.f32 %v1398_v35, %v654_v36 }
 0x187   : > { %v1401_v45 = vadd.f32 %v1400_v43, %v1399_v38 }
 0x188   : > { %v659_v46 = vadd.f32 %v1321_v42, %v2335_v40  ;;  %v1322_v47 = vpop.f32.mrb[18].mxu0 }
 0x189   : > { %v1402_v48 = vpop.f32.mrb[18].mxu1  ;;  %v1323_v49 = vpop.f32.mrb[19].mxu0 }
 0x18a   : > { %v1324_v50 = vadd.f32 %v1323_v49, %v1322_v47  ;;  %v1403_v52 = vpop.f32.mrb[19].mxu1  ;;  %v804_v53 = vadd.f32 %v1401_v45, %v659_v46 }
 0x18b   : > { %v1404_v54 = vadd.f32 %v1403_v52, %v1402_v48 }
 0x18c   : > { %v664_v55 = vadd.f32 %v1324_v50, %v2335_v40  ;;  %v1325_v56 = vpop.f32.mrb[20].mxu0 }
 0x18d   : > { %v1405_v57 = vpop.f32.mrb[20].mxu1  ;;  %v1326_v58 = vpop.f32.mrb[21].mxu0 }
 0x18e   : > { %v1327_v60 = vadd.f32 %v1326_v58, %v1325_v56  ;;  %v1406_v39 = vpop.f32.mrb[21].mxu1  ;;  %v2363_v61 = vadd.f32 %v1404_v54, %v664_v55 }
 0x18f   : > { %v1407_v62 = vadd.f32 %v1406_v39, %v1405_v57 }
 0x190   : > { %v669_v63 = vadd.f32 %v1327_v60, %v2335_v40  ;;  %v1328_v0 = vpop.f32.mrb[22].mxu0 }
 0x191   : > { %v1408_v1 = vpop.f32.mrb[22].mxu1  ;;  %v1329_v3 = vpop.f32.mrb[23].mxu0 }
 0x192   : > { %v1330_v4 = vadd.f32 %v1329_v3, %v1328_v0  ;;  %v1409_v5 = vpop.f32.mrb[23].mxu1  ;;  %v2366_v6 = vadd.f32 %v1407_v62, %v669_v63 }
 0x193   : > { %v1410_v7 = vadd.f32 %v1409_v5, %v1408_v1 }
 0x194   : > { %v674_v8 = vadd.f32 %v1330_v4, %v2335_v40  ;;  %v1331_v9 = vpop.f32.mrb[24].mxu0 }
 0x195   : > { %v1411_v11 = vpop.f32.mrb[24].mxu1  ;;  %v1332_v12 = vpop.f32.mrb[25].mxu0 }
 0x196   : > { %v1333_v13 = vadd.f32 %v1332_v12, %v1331_v9  ;;  %v1412_v14 = vpop.f32.mrb[25].mxu1  ;;  %v2369_v15 = vadd.f32 %v1410_v7, %v674_v8 }
 0x197   : > { %v1413_v16 = vadd.f32 %v1412_v14, %v1411_v11 }
 0x198   : > { %v679_v17 = vadd.f32 %v1333_v13, %v2335_v40  ;;  %v1334_v19 = vpop.f32.mrb[26].mxu0 }
 0x199   : > { %v1414_v20 = vpop.f32.mrb[26].mxu1  ;;  %v1335_v21 = vpop.f32.mrb[27].mxu0 }
 0x19a   : > { %v1336_v22 = vadd.f32 %v1335_v21, %v1334_v19  ;;  %v1415_v23 = vpop.f32.mrb[27].mxu1  ;;  %v2372_v24 = vadd.f32 %v1413_v16, %v679_v17 }
 0x19b   : > { %v1416_v25 = vadd.f32 %v1415_v23, %v1414_v20 }
 0x19c   : > { %v684_v27 = vadd.f32 %v1336_v22, %v2335_v40  ;;  %v1337_v28 = vpop.f32.mrb[28].mxu0 }
 0x19d   : > { %v1417_v29 = vpop.f32.mrb[28].mxu1  ;;  %v1338_v30 = vpop.f32.mrb[29].mxu0 }
 0x19e   : > { %v1339_v31 = vadd.f32 %v1338_v30, %v1337_v28  ;;  %v1418_v32 = vpop.f32.mrb[29].mxu1  ;;  %v2375_v33 = vadd.f32 %v1416_v25, %v684_v27 }
 0x19f   : > { %v1419_v35 = vadd.f32 %v1418_v32, %v1417_v29 }
 0x1a0   : > { %v689_v36 = vadd.f32 %v1339_v31, %v2335_v40  ;;  %v1340_v37 = vpop.f32.mrb[30].mxu0 }
 0x1a1   : > { %v1420_v38 = vpop.f32.mrb[30].mxu1  ;;  %v1341_v41 = vpop.f32.mrb[31].mxu0 }
 0x1a2   : > { %v1342_v42 = vadd.f32 %v1341_v41, %v1340_v37  ;;  %v1421_v43 = vpop.f32.mrb[31].mxu1  ;;  %v2378_v45 = vadd.f32 %v1419_v35, %v689_v36 }
 0x1a3   : > { %v1422_v46 = vadd.f32 %v1421_v43, %v1420_v38 }
 0x1a4   : > { %v694_v47 = vadd.f32 %v1342_v42, %v2335_v40  ;;  %v908_v48 = vpop.f32.mrb[32].mxu0 }
 0x1a5   : > { %v909_v49 = vadd.f32 %v908_v48, %v2338_v51  ;;  %v948_v50 = vpop.f32.mrb[32].mxu1  ;;  %v910_v52 = vpop.f32.mrb[33].mxu0 }
 0x1a6   : > { %v949_v54 = vadd.f32 %v948_v50, %v804_v53  ;;  %v950_v55 = vpop.f32.mrb[33].mxu1  ;;  %v2384_v56 = vadd.f32 %v1422_v46, %v694_v47 }
 0x1a7   : > { %vm987_vm1 = vcmp.ge.f32.partialorder %v909_v49, 0.0  ;;  %v1003_v57 = vmul.f32 0.2, %v909_v49 }
 0x1a8   : > { %vm995_vm2 = vcmp.ge.f32.partialorder %v949_v54, 0.0  ;;  %v1011_v58 = vmul.f32 0.2, %v949_v54  ;;  %v913_v60 = vpop.f32.mrb[34].mxu0 }
 0x1a9   : > { %v1019_v39 = vsel %vm987_vm1, %v909_v49, %v1003_v57  ;;  %v914_v62 = vadd.f32 %v913_v60, %v2341_v59  ;;  %v953_v40 = vpop.f32.mrb[34].mxu1  ;;  %v915_v63 = vpop.f32.mrb[35].mxu0 }
 0x1aa   : > { %1035 = vst [vmem:[%s2387_s4] sm:$0xff] %v1019_v39  ;;  %v1027_v51 = vsel %vm995_vm2, %v949_v54, %v1011_v58  ;;  %v954_v53 = vadd.f32 %v953_v40, %v2363_v61  ;;  %v955_v0 = vpop.f32.mrb[35].mxu1 }
 0x1ab   : > { %1043 = vst [vmem:[%s2387_s4 + $0x40] sm:$0xff] %v1027_v51  ;;  %vm988_vm3 = vcmp.ge.f32.partialorder %v914_v62, 0.0  ;;  %v1004_v1 = vmul.f32 0.2, %v914_v62 }
 0x1ac   : > { %vm996_vm4 = vcmp.ge.f32.partialorder %v954_v53, 0.0  ;;  %v1012_v3 = vmul.f32 0.2, %v954_v53  ;;  %v918_v4 = vpop.f32.mrb[36].mxu0 }
 0x1ad   : > { %v1020_v59 = vsel %vm988_vm3, %v914_v62, %v1004_v1  ;;  %v919_v5 = vadd.f32 %v918_v4, %v2344_v2  ;;  %v958_v7 = vpop.f32.mrb[36].mxu1  ;;  %v920_v8 = vpop.f32.mrb[37].mxu0 }
 0x1ae   : > { %1036 = vst [vmem:[%s2387_s4 + $0x8] sm:$0xff] %v1020_v59  ;;  %v1028_v9 = vsel %vm996_vm4, %v954_v53, %v1012_v3  ;;  %v959_v11 = vadd.f32 %v958_v7, %v2366_v6  ;;  %v960_v61 = vpop.f32.mrb[37].mxu1 }
 0x1af   : > { %1044 = vst [vmem:[%s2387_s4 + $0x48] sm:$0xff] %v1028_v9  ;;  %vm989_vm5 = vcmp.ge.f32.partialorder %v919_v5, 0.0  ;;  %v1005_v12 = vmul.f32 0.2, %v919_v5 }
 0x1b0   : > { %vm997_vm6 = vcmp.ge.f32.partialorder %v959_v11, 0.0  ;;  %v1013_v13 = vmul.f32 0.2, %v959_v11  ;;  %v923_v14 = vpop.f32.mrb[38].mxu0 }
 0x1b1   : > { %v1021_v16 = vsel %vm989_vm5, %v919_v5, %v1005_v12  ;;  %v924_v17 = vadd.f32 %v923_v14, %v2347_v10  ;;  %v963_v19 = vpop.f32.mrb[38].mxu1  ;;  %v925_v2 = vpop.f32.mrb[39].mxu0 }
 0x1b2   : > { %1037 = vst [vmem:[%s2387_s4 + $0x10] sm:$0xff] %v1021_v16  ;;  %v1029_v20 = vsel %vm997_vm6, %v959_v11, %v1013_v13  ;;  %v964_v21 = vadd.f32 %v963_v19, %v2369_v15  ;;  %v965_v6 = vpop.f32.mrb[39].mxu1 }
 0x1b3   : > { %1045 = vst [vmem:[%s2387_s4 + $0x50] sm:$0xff] %v1029_v20  ;;  %vm990_vm7 = vcmp.ge.f32.partialorder %v924_v17, 0.0  ;;  %v1006_v22 = vmul.f32 0.2, %v924_v17 }
 0x1b4   : > { %vm998_vm8 = vcmp.ge.f32.partialorder %v964_v21, 0.0  ;;  %v1014_v23 = vmul.f32 0.2, %v964_v21  ;;  %v928_v25 = vpop.f32.mrb[40].mxu0 }
 0x1b5   : > { %v1022_v27 = vsel %vm990_vm7, %v924_v17, %v1006_v22  ;;  %v929_v28 = vadd.f32 %v928_v25, %v2350_v18  ;;  %v968_v29 = vpop.f32.mrb[40].mxu1  ;;  %v930_v10 = vpop.f32.mrb[41].mxu0 }
 0x1b6   : > { %1038 = vst [vmem:[%s2387_s4 + $0x18] sm:$0xff] %v1022_v27  ;;  %v1030_v30 = vsel %vm998_vm8, %v964_v21, %v1014_v23  ;;  %v969_v31 = vadd.f32 %v968_v29, %v2372_v24  ;;  %v970_v15 = vpop.f32.mrb[41].mxu1 }
 0x1b7   : > { %1046 = vst [vmem:[%s2387_s4 + $0x58] sm:$0xff] %v1030_v30  ;;  %vm991_vm9 = vcmp.ge.f32.partialorder %v929_v28, 0.0  ;;  %v1007_v32 = vmul.f32 0.2, %v929_v28 }
 0x1b8   : > { %vm999_vm10 = vcmp.ge.f32.partialorder %v969_v31, 0.0  ;;  %v1015_v35 = vmul.f32 0.2, %v969_v31  ;;  %v933_v36 = vpop.f32.mrb[42].mxu0 }
 0x1b9   : > { %v1023_v37 = vsel %vm991_vm9, %v929_v28, %v1007_v32  ;;  %v934_v38 = vadd.f32 %v933_v36, %v2353_v26  ;;  %v973_v41 = vpop.f32.mrb[42].mxu1  ;;  %v935_v18 = vpop.f32.mrb[43].mxu0 }
 0x1ba   : > { %1039 = vst [vmem:[%s2387_s4 + $0x20] sm:$0xff] %v1023_v37  ;;  %v1031_v42 = vsel %vm999_vm10, %v969_v31, %v1015_v35  ;;  %v974_v43 = vadd.f32 %v973_v41, %v2375_v33  ;;  %v975_v24 = vpop.f32.mrb[43].mxu1 }
 0x1bb   : > { %1047 = vst [vmem:[%s2387_s4 + $0x60] sm:$0xff] %v1031_v42  ;;  %vm992_vm11 = vcmp.ge.f32.partialorder %v934_v38, 0.0  ;;  %v1008_v46 = vmul.f32 0.2, %v934_v38 }
 0x1bc   : > { %vm1000_vm12 = vcmp.ge.f32.partialorder %v974_v43, 0.0  ;;  %v1016_v47 = vmul.f32 0.2, %v974_v43  ;;  %v938_v48 = vpop.f32.mrb[44].mxu0 }
 0x1bd   : > { %v1024_v49 = vsel %vm992_vm11, %v934_v38, %v1008_v46  ;;  %v939_v50 = vadd.f32 %v938_v48, %v2356_v34  ;;  %v978_v52 = vpop.f32.mrb[44].mxu1  ;;  %v940_v26 = vpop.f32.mrb[45].mxu0 }
 0x1be   : > { %1040 = vst [vmem:[%s2387_s4 + $0x28] sm:$0xff] %v1024_v49  ;;  %v1032_v54 = vsel %vm1000_vm12, %v974_v43, %v1016_v47  ;;  %v979_v55 = vadd.f32 %v978_v52, %v2378_v45  ;;  %v980_v33 = vpop.f32.mrb[45].mxu1 }
 0x1bf   : > { %1048 = vst [vmem:[%s2387_s4 + $0x68] sm:$0xff] %v1032_v54  ;;  %vm993_vm13 = vcmp.ge.f32.partialorder %v939_v50, 0.0  ;;  %v1009_v57 = vmul.f32 0.2, %v939_v50 }
 0x1c0   : > { %vm1001_vm14 = vcmp.ge.f32.partialorder %v979_v55, 0.0  ;;  %v1017_v58 = vmul.f32 0.2, %v979_v55  ;;  %v943_v60 = vpop.f32.mrb[46].mxu0 }
 0x1c1   : > { %v1025_v39 = vsel %vm993_vm13, %v939_v50, %v1009_v57  ;;  %v944_v34 = vadd.f32 %v943_v60, %v2359_v44  ;;  %v983_v62 = vpop.f32.mrb[46].mxu1  ;;  %v945_v40 = vpop.f32.mrb[47].mxu0 }
 0x1c2   : > { %1041 = vst [vmem:[%s2387_s4 + $0x30] sm:$0xff] %v1025_v39  ;;  %v1033_v63 = vsel %vm1001_vm14, %v979_v55, %v1017_v58  ;;  %v984_v45 = vadd.f32 %v983_v62, %v2384_v56  ;;  %v985_v51 = vpop.f32.mrb[47].mxu1 }
 0x1c3   : > { %1049 = vst [vmem:[%s2387_s4 + $0x70] sm:$0xff] %v1033_v63  ;;  %vm994_vm15 = vcmp.ge.f32.partialorder %v944_v34, 0.0  ;;  %v1010_v53 = vmul.f32 0.2, %v944_v34 }
 0x1c4   : > { %vm1002_vm0 = vcmp.ge.f32.partialorder %v984_v45, 0.0  ;;  %v1018_v0 = vmul.f32 0.2, %v984_v45 }
 0x1c5   : > { %v1026_v1 = vsel %vm994_vm15, %v944_v34, %v1010_v53 }
 0x1c6   : > { %1042 = vst [vmem:[%s2387_s4 + $0x38] sm:$0xff] %v1026_v1  ;;  %v1034_v3 = vsel %vm1002_vm0, %v984_v45, %v1018_v0 }
 0x1c7   : > { %1050 = vst [vmem:[%s2387_s4 + $0x78] sm:$0xff] %v1034_v3 }
 0x1c8   : > { %s1259_s12 = sshll.u32 %s1839_s21, 4  ;;  %s1084_s14 = sshll.u32 %s2387_s4, 4  ;;  %s1085_s14 = int_to_ptr.vmem [resolvable:$true] %s1084_s14 }
 0x1c9   : > { %s1063_s23 = sadd.s32 %s1843_s22, %s1259_s12  ;;  %s2526_s10 = sld [smem:[#allocation27_spill]] }
 0x1ca   : > { %s1260_s9 = sshll.u32 %s1063_s23, 7  ;;  %s1868_s3 = smov 1024  }
 0x1cb   : > { %p2527_p13 = scmp.ne.s32.totalorder %s2520_s15, 0  ;;  %s1869_s11 = smov 4096  }
 0x1cc   : > { %s1870_s29 = smov 8   ;;  %s1871_s21 = smov 128  }
 0x1cd   : > { %1563 = sst [smem:[#allocation11]] (%p2527_p13), %s1868_s3  ;;  %s1872_s22 = smov 256  }
 0x1ce   : > { %1564 = sst [smem:[#allocation11 + $0x1]] (%p2527_p13), %s1869_s11  ;;  %s1873_s28 = smov [#allocation10]  }
 0x1cf   : > { %s1067_s26 = scalar_lea.hbm %s2526_s10, %s1260_s9  ;;  %1565 = sst [smem:[#allocation11 + $0x2]] (%p2527_p13), %s1870_s29 }
 0x1d0   : > { %1566 = sst [smem:[#allocation11 + $0x3]] (%p2527_p13), %s1871_s21  ;;  %s1874_s7 = smov 0  }
 0x1d1   : > { %1567 = sst [smem:[#allocation11 + $0x4]] (%p2527_p13), %s1872_s22 }
 0x1d2   : > { %1568 = sst [smem:[#allocation11 + $0x5]] (%p2527_p13), %s1870_s29 }
 0x1d3   : > { %1569 = dma.general (%p2527_p13), %s1085_s14, 2048, %s1067_s26, %s1052_s30, %s1873_s28, [#allocation11], %s1874_s7, 0  }
 0x1d4 PF: > { %s2528_s18 = sld [smem:[#allocation16_spill]]  ;;  %s2529_s0 = sld [smem:[#allocation25_spill]] }
 0x1d5   : > { %p1575_p6 = scmp.ge.s32.totalorder %s1855_s25, 2 }
 0x1da   : > { %s1112_s8 = sand.u32 1, %s2528_s18   ;;  %p2530_p9 = scmp.ne.s32.totalorder %s2529_s0, 0 }
 0x1db   : > { %s1113_s6 = scalar_lea.sflag [#allocation4], %s1112_s8 }
 0x1dc   : > { %p1572_p2 = pnand %p1575_p6, %p2530_p9 }
 0x1de   : > { %1798 = dma.done.wait (!%p1572_p2), %s1113_s6, 2048  }
 0x1df   : > { %1800 = vsyncadd (!%p1572_p2), %s1113_s6, 4294965248  ;;  %s22_s25 = sadd.s32 1, %s1855_s25   ;;  %s2532_s15 = sld [smem:[#allocation17_spill]] }
 0x1e0   : > { %p2445_p7 = scmp.ge.s32.totalorder %s22_s25, 6   ;;  %s2533_s14 = sld [smem:[#allocation24_spill]] }
 0x1e1   : > { %s2534_s4 = sld [smem:[#allocation23_spill]]  ;;  %s2535_s30 = sld [smem:[#allocation18_spill]] }
 0x1e2   : > { %s2536_s20 = sld [smem:[#allocation22_spill]]  ;;  %s2537_s21 = sld [smem:[#allocation19_spill]] }
 0x1e3   : > { %s2538_s23 = sld [smem:[#allocation20_spill]]  ;;  %s2539_s9 = sld [smem:[#allocation21_spill]] }
 0x1e4   : > { %s2540_s12 = smov %s1807_s13  ;;  %s2545_s18 = smov %s1831_s19 }
 0x1e5   : > { %s2541_s13 = smov %s2532_s15  ;;  %s2542_s15 = smov %s1819_s16 }
 0x1e6   : > { %s2543_s16 = smov %s1823_s17  ;;  %s2547_s22 = smov %s1851_s24 }
 0x1e7   : > { %s2544_s17 = smov %s2534_s4  ;;  %s2546_s19 = smov %s2535_s30 }
 0x1e8   :  { %21 = sbr.rel (!%p2445_p7) target bundleno = 15 (0xf), region = 103 }
 0x1e9   : > { %s2548_s24 = smov %s2539_s9 }
 0x1ef   :  { %1118 = vsyncpa [#allocation3], 1 }
 0x1f0   :  { %1120 = vsyncpa [#allocation3 + $0x1], 1 }
 0x1f1   :  { %1121 = vsyncpa [#allocation6], 1 }
 0x1f2   :  { %1123 = vsyncpa [#allocation6 + $0x1], 1 }
 0x1f3   :  { %1124 = vsyncpa [#allocation4], 1 }
 0x1f4   :  { %1126 = vsyncpa [#allocation4 + $0x1], 1 }

</bundles_post_ra>
